<compile_context>
chip_gen: v7x
topology: tpu7x:2x2x1
jax: 0.10.0
libtpu: 0.0.40
codegen_flags: <defaults>
</compile_context>

<pallas_src>
import jax
import jax.numpy as jnp
from jax.experimental import pallas as pl
from jax.experimental.pallas import tpu as pltpu

NEG_SLOPE = 0.1
BN_EPS = 1e-5
C1_PAD = 256  # layer-1 input channels padded 239 -> 256 (dense lanes)


def _disc_kernel(x_ref, w1_ref, w2_ref, g2_ref, b2_ref, w3_ref, g3_ref,
                 b3_ref, w4_ref, g4_ref, b4_ref, w5_ref, o_ref,
                 h1_ref, h2_ref, h3_ref, h4_ref):
    """Fused Discriminator forward.

    x_ref:  (N, L+2, 256)  channel- and halo-padded input (channels-last)
    wX_ref: (K*Cin, Cout)  im2col-layout conv weights (w5: (4, 256))
    gX/bX:  (1, C)         BatchNorm scale / shift
    o_ref:  (N, L-3)       sigmoid output, lane-dense
    hX_ref: (N, L+2, C)    VMEM scratch: padded intermediate activations
    """
    n, lpad, _ = x_ref.shape
    l = lpad - 2  # layers 1-4: K=3, pad=1, stride=1  =>  Lout == L

    def conv(src_ref, w_ref, ksize, start, l_out):
        """Conv1d as MXU matmul(s) with the batch folded into M = n*l_out."""
        cin = src_ref.shape[2]
        cout = w_ref.shape[1]

        def chunk(k):
            return src_ref[:, start + k:start + k + l_out, :].reshape(
                n * l_out, cin)

        if cin % 128 == 0:
            # im2col: one matmul, contraction = ksize*cin (lane-aligned concat).
            cols = jnp.concatenate([chunk(k) for k in range(ksize)], axis=-1)
            return jnp.dot(cols, w_ref[...],
                           preferred_element_type=jnp.float32)
        # Channel chunk not 128-aligned: K shifted matmuls, f32 accumulate.
        y = jnp.zeros((n * l_out, cout), jnp.float32)
        for k in range(ksize):
            y = y + jnp.dot(chunk(k), w_ref[k * cin:(k + 1) * cin, :],
                            preferred_element_type=jnp.float32)
        return y

    def store_with_halo(dst_ref, val):
        # Write `val` (N, L, C) into the interior of a zero-haloed buffer.
        c = dst_ref.shape[2]
        zrow = jnp.zeros((n, 1, c), dst_ref.dtype)
        dst_ref[:, 0:1, :] = zrow
        dst_ref[:, lpad - 1:lpad, :] = zrow
        dst_ref[:, 1:l + 1, :] = val

    def block(src_ref, w_ref, g_ref, b_ref, dst_ref):
        y = conv(src_ref, w_ref, 3, 0, l)                    # (n*l, cout) f32
        if g_ref is not None:
            # nn.BatchNorm1d (training mode): biased batch stats over (N, L).
            mean = jnp.mean(y, axis=0, keepdims=True)
            var = jnp.mean((y - mean) ** 2, axis=0, keepdims=True)
            y = (y - mean) * jax.lax.rsqrt(var + BN_EPS)
            y = y * g_ref[...] + b_ref[...]
        y = jnp.where(y > 0, y, NEG_SLOPE * y)               # LeakyReLU(0.1)
        store_with_halo(dst_ref, y.reshape(n, l, dst_ref.shape[2]))

    block(x_ref, w1_ref, None, None, h1_ref)
    block(h1_ref, w2_ref, g2_ref, b2_ref, h2_ref)
    block(h2_ref, w3_ref, g3_ref, b3_ref, h3_ref)
    block(h3_ref, w4_ref, g4_ref, b4_ref, h4_ref)

    # Layer 5: Conv1d(256 -> 1, K=4, pad=0) + Sigmoid.  Cout == 1, so compute
    # it as multiply + lane-reduce and emit a lane-dense (N, L-3) slab.
    l5 = l - 3
    logits = jnp.zeros((n, l5), jnp.float32)
    for k in range(4):
        logits = logits + jnp.sum(
            h4_ref[:, 1 + k:1 + k + l5, :] * w5_ref[k:k + 1, :], axis=-1)
    o_ref[...] = jax.nn.sigmoid(logits)


def discriminator_forward(params, x_ncl):
    """x_ncl: (N, 239, L) in PyTorch NCL layout -> (N, 1, L - 3)."""
    n, cin, length = x_ncl.shape
    lout5 = length - 3
    ndf = params["w1"].shape[2]

    # Channels-last, then one pad op: channels 239 -> 256 plus 1-row halo.
    h = jnp.transpose(x_ncl, (0, 2, 1))                       # (N, L, 239)
    xp = jnp.pad(h, ((0, 0), (1, 1), (0, C1_PAD - cin)))      # (N, L+2, 256)

    # Weights in im2col layout (K*Cin, Cout); w1 rows padded to match channels.
    w1 = jnp.pad(params["w1"], ((0, 0), (0, C1_PAD - cin), (0, 0)))
    w1 = w1.reshape(3 * C1_PAD, ndf)
    w2 = params["w2"].reshape(3 * ndf, ndf * 2)
    w3 = params["w3"].reshape(3 * ndf * 2, ndf * 4)
    w4 = params["w4"].reshape(3 * ndf * 4, ndf * 8)
    w5 = params["w5"].reshape(4, ndf * 8)                     # Cout == 1 squeezed

    g2 = params["g2"].reshape(1, -1); b2 = params["b2"].reshape(1, -1)
    g3 = params["g3"].reshape(1, -1); b3 = params["b3"].reshape(1, -1)
    g4 = params["g4"].reshape(1, -1); b4 = params["b4"].reshape(1, -1)

    args = [xp, w1, w2, g2, b2, w3, g3, b3, w4, g4, b4, w5]

    # Advisory cost estimate so XLA schedules around this small custom call.
    flops = 0
    for k, ci, co, lo in ((3, C1_PAD, ndf, length),
                          (3, ndf, ndf * 2, length),
                          (3, ndf * 2, ndf * 4, length),
                          (3, ndf * 4, ndf * 8, length),
                          (4, ndf * 8, 1, lout5)):
        flops += 2 * n * lo * k * ci * co
    bytes_accessed = sum(int(a.size) * a.dtype.itemsize for a in args)
    bytes_accessed += n * lout5 * 4
    transcendentals = n * lout5 + (ndf * 2 + ndf * 4 + ndf * 8)

    vmem = pl.BlockSpec(memory_space=pltpu.MemorySpace.VMEM)
    out = pl.pallas_call(
        _disc_kernel,
        out_shape=jax.ShapeDtypeStruct((n, lout5), jnp.float32),
        in_specs=[vmem] * len(args),
        out_specs=vmem,
        scratch_shapes=[
            pltpu.VMEM((n, length + 2, ndf), jnp.float32),
            pltpu.VMEM((n, length + 2, ndf * 2), jnp.float32),
            pltpu.VMEM((n, length + 2, ndf * 4), jnp.float32),
            pltpu.VMEM((n, length + 2, ndf * 8), jnp.float32),
        ],
        cost_estimate=pl.CostEstimate(
            flops=int(flops), transcendentals=int(transcendentals),
            bytes_accessed=int(bytes_accessed)),
    )(*args)

    # TODO(synk): for large batches on v7x, add a batch grid axis with
    # dimension_semantics=("parallel",) so both TensorCores are used.
    return out[:, None, :]                                    # (N, 1, L - 3)


def init_params(key, ndf=32):
    ks = jax.random.split(key, 5)

    def w(k, K, cin, cout):
        return jax.random.normal(k, (K, cin, cout), jnp.float32) * 0.05

    return {
        "w1": w(ks[0], 3, 239, ndf),
        "w2": w(ks[1], 3, ndf, ndf * 2),
        "g2": jnp.ones((ndf * 2,), jnp.float32),
        "b2": jnp.zeros((ndf * 2,), jnp.float32),
        "w3": w(ks[2], 3, ndf, ndf * 4)[:, :ndf * 2, :] if False else w(ks[2], 3, ndf * 2, ndf * 4),
        "g3": jnp.ones((ndf * 4,), jnp.float32),
        "b3": jnp.zeros((ndf * 4,), jnp.float32),
        "w4": w(ks[3], 3, ndf * 4, ndf * 8),
        "g4": jnp.ones((ndf * 8,), jnp.float32),
        "b4": jnp.zeros((ndf * 8,), jnp.float32),
        "w5": w(ks[4], 4, ndf * 8, 1),
    }


def reference_forward(params, x_ncl):
    """Pure-JAX f32 (HIGHEST precision) reference with identical semantics."""
    h = jnp.transpose(x_ncl, (0, 2, 1))

    def conv(h, w, pad):
        L = h.shape[1]
        K = w.shape[0]
        hp = jnp.pad(h, ((0, 0), (pad, pad), (0, 0))) if pad else h
        Lout = L + 2 * pad - K + 1
        acc = jnp.zeros((h.shape[0], Lout, w.shape[2]), jnp.float32)
        for k in range(K):
            acc = acc + jnp.einsum("nlc,cd->nld", hp[:, k:k + Lout, :], w[k],
                                   precision=jax.lax.Precision.HIGHEST)
        return acc

    def bn(h, g, b):
        m = h.mean(axis=(0, 1), keepdims=True)
        v = ((h - m) ** 2).mean(axis=(0, 1), keepdims=True)
        return (h - m) * jax.lax.rsqrt(v + BN_EPS) * g + b

    def lrelu(h):
        return jnp.where(h > 0, h, NEG_SLOPE * h)

    h = lrelu(conv(h, params["w1"], 1))
    h = lrelu(bn(conv(h, params["w2"], 1), params["g2"], params["b2"]))
    h = lrelu(bn(conv(h, params["w3"], 1), params["g3"], params["b3"]))
    h = lrelu(bn(conv(h, params["w4"], 1), params["g4"], params["b4"]))
    h = jax.nn.sigmoid(conv(h, params["w5"], 0))
    return jnp.transpose(h, (0, 2, 1))


if __name__ == "__main__":
    key = jax.random.PRNGKey(0)
    kx, kp = jax.random.split(key)

    # PyTorch Conv1d input: (batch, channels=239, length=16)
    x = jax.random.normal(kx, (2, 239, 16), jnp.float32)
    params = init_params(kp, ndf=32)

    fwd = jax.jit(discriminator_forward)
    out = jax.block_until_ready(fwd(params, x))
    assert out.shape == (2, 1, 13), out.shape

    # Kernel uses default MXU precision (bf16 passes, f32 accumulation); the
    # reference is full-f32 HIGHEST, so allow a correspondingly looser bound.
    ref = reference_forward(params, x)
    err = float(jnp.max(jnp.abs(out - ref)))
    assert err < 2e-2, f"max abs err {err}"

    # TODO(synk): BatchNorm running-stat updates (a training side effect) are
    # not reproduced; only the forward output is.
    print("KERNEL_OK")
</pallas_src>

<mosaic_0001>
module attributes {stable_mosaic.version = 11 : i64} {
  func.func @_disc_kernel(%arg0: memref<2x18x256xf32, #tpu.memory_space<vmem>>, %arg1: memref<768x32xf32, #tpu.memory_space<vmem>>, %arg2: memref<96x64xf32, #tpu.memory_space<vmem>>, %arg3: memref<1x64xf32, #tpu.memory_space<vmem>>, %arg4: memref<1x64xf32, #tpu.memory_space<vmem>>, %arg5: memref<192x128xf32, #tpu.memory_space<vmem>>, %arg6: memref<1x128xf32, #tpu.memory_space<vmem>>, %arg7: memref<1x128xf32, #tpu.memory_space<vmem>>, %arg8: memref<384x256xf32, #tpu.memory_space<vmem>>, %arg9: memref<1x256xf32, #tpu.memory_space<vmem>>, %arg10: memref<1x256xf32, #tpu.memory_space<vmem>>, %arg11: memref<4x256xf32, #tpu.memory_space<vmem>>, %arg12: memref<2x13xf32, #tpu.memory_space<vmem>>, %arg13: memref<2x18x32xf32, #tpu.memory_space<vmem>>, %arg14: memref<2x18x64xf32, #tpu.memory_space<vmem>>, %arg15: memref<2x18x128xf32, #tpu.memory_space<vmem>>, %arg16: memref<2x18x256xf32, #tpu.memory_space<vmem>>) attributes {dimension_semantics = [], scalar_prefetch = 0 : i64, scratch_operands = 4 : i64, tpu.core_type = #tpu.core_type<tc>} {
    %c0 = arith.constant 0 : index
    %c0_0 = arith.constant 0 : index
    %c0_1 = arith.constant 0 : index
    %0 = vector.load %arg0[%c0, %c0_0, %c0_1] : memref<2x18x256xf32, #tpu.memory_space<vmem>>, vector<2x16x256xf32>
    %1 = vector.shape_cast %0 : vector<2x16x256xf32> to vector<32x256xf32>
    %c0_2 = arith.constant 0 : index
    %c1 = arith.constant 1 : index
    %c0_3 = arith.constant 0 : index
    %2 = vector.load %arg0[%c0_2, %c1, %c0_3] : memref<2x18x256xf32, #tpu.memory_space<vmem>>, vector<2x16x256xf32>
    %3 = vector.shape_cast %2 : vector<2x16x256xf32> to vector<32x256xf32>
    %c0_4 = arith.constant 0 : index
    %c2 = arith.constant 2 : index
    %c0_5 = arith.constant 0 : index
    %4 = vector.load %arg0[%c0_4, %c2, %c0_5] : memref<2x18x256xf32, #tpu.memory_space<vmem>>, vector<2x16x256xf32>
    %5 = vector.shape_cast %4 : vector<2x16x256xf32> to vector<32x256xf32>
    %6 = tpu.concatenate %1, %3, %5 in 1 : vector<32x256xf32>, vector<32x256xf32>, vector<32x256xf32> -> vector<32x768xf32>
    %c0_6 = arith.constant 0 : index
    %c0_7 = arith.constant 0 : index
    %7 = vector.load %arg1[%c0_6, %c0_7] : memref<768x32xf32, #tpu.memory_space<vmem>>, vector<768x32xf32>
    %cst = arith.constant dense<0.000000e+00> : vector<32x32xf32>
    %8 = tpu.matmul %6, %7, %cst {dimension_numbers = #tpu.dot_dimension_numbers<[1], [0], [0], [1], [0, 0, 1, 1], [], []>} : vector<32x768xf32>, vector<768x32xf32>, vector<32x32xf32> -> vector<32x32xf32>
    %cst_8 = arith.constant 0.000000e+00 : f32
    %9 = vector.broadcast %cst_8 : f32 to vector<32x32xf32>
    %10 = arith.cmpf ogt, %8, %9 : vector<32x32xf32>
    %cst_9 = arith.constant 1.000000e-01 : f32
    %11 = vector.broadcast %cst_9 : f32 to vector<32x32xf32>
    %12 = arith.mulf %11, %8 : vector<32x32xf32>
    %13 = arith.select %10, %8, %12 : vector<32x32xi1>, vector<32x32xf32>
    %14 = vector.shape_cast %13 : vector<32x32xf32> to vector<2x16x32xf32>
    %cst_10 = arith.constant 0.000000e+00 : f32
    %15 = vector.broadcast %cst_10 : f32 to vector<2x1x32xf32>
    %c0_11 = arith.constant 0 : index
    %c0_12 = arith.constant 0 : index
    %c0_13 = arith.constant 0 : index
    %16 = vector.load %arg13[%c0_11, %c0_12, %c0_13] : memref<2x18x32xf32, #tpu.memory_space<vmem>>, vector<2x1x32xf32>
    tpu.vector_store %arg13[%c0_11, %c0_12, %c0_13], %15 {strides = array<i32>} : memref<2x18x32xf32, #tpu.memory_space<vmem>>, vector<2x1x32xf32>,
    %c0_14 = arith.constant 0 : index
    %c17 = arith.constant 17 : index
    %c0_15 = arith.constant 0 : index
    %17 = vector.load %arg13[%c0_14, %c17, %c0_15] : memref<2x18x32xf32, #tpu.memory_space<vmem>>, vector<2x1x32xf32>
    tpu.vector_store %arg13[%c0_14, %c17, %c0_15], %15 {strides = array<i32>} : memref<2x18x32xf32, #tpu.memory_space<vmem>>, vector<2x1x32xf32>,
    %c0_16 = arith.constant 0 : index
    %c1_17 = arith.constant 1 : index
    %c0_18 = arith.constant 0 : index
    %18 = vector.load %arg13[%c0_16, %c1_17, %c0_18] : memref<2x18x32xf32, #tpu.memory_space<vmem>>, vector<2x16x32xf32>
    tpu.vector_store %arg13[%c0_16, %c1_17, %c0_18], %14 {strides = array<i32>} : memref<2x18x32xf32, #tpu.memory_space<vmem>>, vector<2x16x32xf32>,
    %cst_19 = arith.constant 0.000000e+00 : f32
    %19 = vector.broadcast %cst_19 : f32 to vector<32x64xf32>
    %c0_20 = arith.constant 0 : index
    %c0_21 = arith.constant 0 : index
    %c0_22 = arith.constant 0 : index
    %20 = vector.load %arg13[%c0_20, %c0_21, %c0_22] : memref<2x18x32xf32, #tpu.memory_space<vmem>>, vector<2x16x32xf32>
    %21 = vector.shape_cast %20 : vector<2x16x32xf32> to vector<32x32xf32>
    %c0_23 = arith.constant 0 : index
    %c0_24 = arith.constant 0 : index
    %22 = vector.load %arg2[%c0_23, %c0_24] : memref<96x64xf32, #tpu.memory_space<vmem>>, vector<32x64xf32>
    %cst_25 = arith.constant dense<0.000000e+00> : vector<32x64xf32>
    %23 = tpu.matmul %21, %22, %cst_25 {dimension_numbers = #tpu.dot_dimension_numbers<[1], [0], [0], [1], [0, 0, 1, 1], [], []>} : vector<32x32xf32>, vector<32x64xf32>, vector<32x64xf32> -> vector<32x64xf32>
    %24 = arith.addf %19, %23 : vector<32x64xf32>
    %c0_26 = arith.constant 0 : index
    %c1_27 = arith.constant 1 : index
    %c0_28 = arith.constant 0 : index
    %25 = vector.load %arg13[%c0_26, %c1_27, %c0_28] : memref<2x18x32xf32, #tpu.memory_space<vmem>>, vector<2x16x32xf32>
    %26 = vector.shape_cast %25 : vector<2x16x32xf32> to vector<32x32xf32>
    %c32 = arith.constant 32 : index
    %c0_29 = arith.constant 0 : index
    %27 = vector.load %arg2[%c32, %c0_29] : memref<96x64xf32, #tpu.memory_space<vmem>>, vector<32x64xf32>
    %cst_30 = arith.constant dense<0.000000e+00> : vector<32x64xf32>
    %28 = tpu.matmul %26, %27, %cst_30 {dimension_numbers = #tpu.dot_dimension_numbers<[1], [0], [0], [1], [0, 0, 1, 1], [], []>} : vector<32x32xf32>, vector<32x64xf32>, vector<32x64xf32> -> vector<32x64xf32>
    %29 = arith.addf %24, %28 : vector<32x64xf32>
    %c0_31 = arith.constant 0 : index
    %c2_32 = arith.constant 2 : index
    %c0_33 = arith.constant 0 : index
    %30 = vector.load %arg13[%c0_31, %c2_32, %c0_33] : memref<2x18x32xf32, #tpu.memory_space<vmem>>, vector<2x16x32xf32>
    %31 = vector.shape_cast %30 : vector<2x16x32xf32> to vector<32x32xf32>
    %c64 = arith.constant 64 : index
    %c0_34 = arith.constant 0 : index
    %32 = vector.load %arg2[%c64, %c0_34] : memref<96x64xf32, #tpu.memory_space<vmem>>, vector<32x64xf32>
    %cst_35 = arith.constant dense<0.000000e+00> : vector<32x64xf32>
    %33 = tpu.matmul %31, %32, %cst_35 {dimension_numbers = #tpu.dot_dimension_numbers<[1], [0], [0], [1], [0, 0, 1, 1], [], []>} : vector<32x32xf32>, vector<32x64xf32>, vector<32x64xf32> -> vector<32x64xf32>
    %34 = arith.addf %29, %33 : vector<32x64xf32>
    %cst_36 = arith.constant dense<0.000000e+00> : vector<64xf32>
    %35 = vector.multi_reduction <add>, %34, %cst_36 [0] : vector<32x64xf32> to vector<64xf32>
    %36 = vector.shape_cast %35 : vector<64xf32> to vector<1x64xf32>
    %cst_37 = arith.constant 3.200000e+01 : f32
    %37 = vector.broadcast %cst_37 : f32 to vector<1x64xf32>
    %38 = arith.divf %36, %37 : vector<1x64xf32>
    %39 = vector.broadcast %38 : vector<1x64xf32> to vector<32x64xf32>
    %40 = arith.subf %34, %39 : vector<32x64xf32>
    %41 = arith.mulf %40, %40 : vector<32x64xf32>
    %cst_38 = arith.constant dense<0.000000e+00> : vector<64xf32>
    %42 = vector.multi_reduction <add>, %41, %cst_38 [0] : vector<32x64xf32> to vector<64xf32>
    %43 = vector.shape_cast %42 : vector<64xf32> to vector<1x64xf32>
    %cst_39 = arith.constant 3.200000e+01 : f32
    %44 = vector.broadcast %cst_39 : f32 to vector<1x64xf32>
    %45 = arith.divf %43, %44 : vector<1x64xf32>
    %46 = vector.broadcast %38 : vector<1x64xf32> to vector<32x64xf32>
    %47 = arith.subf %34, %46 : vector<32x64xf32>
    %cst_40 = arith.constant 9.99999974E-6 : f32
    %48 = vector.broadcast %cst_40 : f32 to vector<1x64xf32>
    %49 = arith.addf %45, %48 : vector<1x64xf32>
    %50 = math.rsqrt %49 : vector<1x64xf32>
    %51 = vector.broadcast %50 : vector<1x64xf32> to vector<32x64xf32>
    %52 = arith.mulf %47, %51 : vector<32x64xf32>
    %c0_41 = arith.constant 0 : index
    %c0_42 = arith.constant 0 : index
    %53 = vector.load %arg3[%c0_41, %c0_42] : memref<1x64xf32, #tpu.memory_space<vmem>>, vector<1x64xf32>
    %54 = vector.broadcast %53 : vector<1x64xf32> to vector<32x64xf32>
    %55 = arith.mulf %52, %54 : vector<32x64xf32>
    %c0_43 = arith.constant 0 : index
    %c0_44 = arith.constant 0 : index
    %56 = vector.load %arg4[%c0_43, %c0_44] : memref<1x64xf32, #tpu.memory_space<vmem>>, vector<1x64xf32>
    %57 = vector.broadcast %56 : vector<1x64xf32> to vector<32x64xf32>
    %58 = arith.addf %55, %57 : vector<32x64xf32>
    %cst_45 = arith.constant 0.000000e+00 : f32
    %59 = vector.broadcast %cst_45 : f32 to vector<32x64xf32>
    %60 = arith.cmpf ogt, %58, %59 : vector<32x64xf32>
    %cst_46 = arith.constant 1.000000e-01 : f32
    %61 = vector.broadcast %cst_46 : f32 to vector<32x64xf32>
    %62 = arith.mulf %61, %58 : vector<32x64xf32>
    %63 = arith.select %60, %58, %62 : vector<32x64xi1>, vector<32x64xf32>
    %64 = vector.shape_cast %63 : vector<32x64xf32> to vector<2x16x64xf32>
    %cst_47 = arith.constant 0.000000e+00 : f32
    %65 = vector.broadcast %cst_47 : f32 to vector<2x1x64xf32>
    %c0_48 = arith.constant 0 : index
    %c0_49 = arith.constant 0 : index
    %c0_50 = arith.constant 0 : index
    %66 = vector.load %arg14[%c0_48, %c0_49, %c0_50] : memref<2x18x64xf32, #tpu.memory_space<vmem>>, vector<2x1x64xf32>
    tpu.vector_store %arg14[%c0_48, %c0_49, %c0_50], %65 {strides = array<i32>} : memref<2x18x64xf32, #tpu.memory_space<vmem>>, vector<2x1x64xf32>,
    %c0_51 = arith.constant 0 : index
    %c17_52 = arith.constant 17 : index
    %c0_53 = arith.constant 0 : index
    %67 = vector.load %arg14[%c0_51, %c17_52, %c0_53] : memref<2x18x64xf32, #tpu.memory_space<vmem>>, vector<2x1x64xf32>
    tpu.vector_store %arg14[%c0_51, %c17_52, %c0_53], %65 {strides = array<i32>} : memref<2x18x64xf32, #tpu.memory_space<vmem>>, vector<2x1x64xf32>,
    %c0_54 = arith.constant 0 : index
    %c1_55 = arith.constant 1 : index
    %c0_56 = arith.constant 0 : index
    %68 = vector.load %arg14[%c0_54, %c1_55, %c0_56] : memref<2x18x64xf32, #tpu.memory_space<vmem>>, vector<2x16x64xf32>
    tpu.vector_store %arg14[%c0_54, %c1_55, %c0_56], %64 {strides = array<i32>} : memref<2x18x64xf32, #tpu.memory_space<vmem>>, vector<2x16x64xf32>,
    %cst_57 = arith.constant 0.000000e+00 : f32
    %69 = vector.broadcast %cst_57 : f32 to vector<32x128xf32>
    %c0_58 = arith.constant 0 : index
    %c0_59 = arith.constant 0 : index
    %c0_60 = arith.constant 0 : index
    %70 = vector.load %arg14[%c0_58, %c0_59, %c0_60] : memref<2x18x64xf32, #tpu.memory_space<vmem>>, vector<2x16x64xf32>
    %71 = vector.shape_cast %70 : vector<2x16x64xf32> to vector<32x64xf32>
    %c0_61 = arith.constant 0 : index
    %c0_62 = arith.constant 0 : index
    %72 = vector.load %arg5[%c0_61, %c0_62] : memref<192x128xf32, #tpu.memory_space<vmem>>, vector<64x128xf32>
    %cst_63 = arith.constant dense<0.000000e+00> : vector<32x128xf32>
    %73 = tpu.matmul %71, %72, %cst_63 {dimension_numbers = #tpu.dot_dimension_numbers<[1], [0], [0], [1], [0, 0, 1, 1], [], []>} : vector<32x64xf32>, vector<64x128xf32>, vector<32x128xf32> -> vector<32x128xf32>
    %74 = arith.addf %69, %73 : vector<32x128xf32>
    %c0_64 = arith.constant 0 : index
    %c1_65 = arith.constant 1 : index
    %c0_66 = arith.constant 0 : index
    %75 = vector.load %arg14[%c0_64, %c1_65, %c0_66] : memref<2x18x64xf32, #tpu.memory_space<vmem>>, vector<2x16x64xf32>
    %76 = vector.shape_cast %75 : vector<2x16x64xf32> to vector<32x64xf32>
    %c64_67 = arith.constant 64 : index
    %c0_68 = arith.constant 0 : index
    %77 = vector.load %arg5[%c64_67, %c0_68] : memref<192x128xf32, #tpu.memory_space<vmem>>, vector<64x128xf32>
    %cst_69 = arith.constant dense<0.000000e+00> : vector<32x128xf32>
    %78 = tpu.matmul %76, %77, %cst_69 {dimension_numbers = #tpu.dot_dimension_numbers<[1], [0], [0], [1], [0, 0, 1, 1], [], []>} : vector<32x64xf32>, vector<64x128xf32>, vector<32x128xf32> -> vector<32x128xf32>
    %79 = arith.addf %74, %78 : vector<32x128xf32>
    %c0_70 = arith.constant 0 : index
    %c2_71 = arith.constant 2 : index
    %c0_72 = arith.constant 0 : index
    %80 = vector.load %arg14[%c0_70, %c2_71, %c0_72] : memref<2x18x64xf32, #tpu.memory_space<vmem>>, vector<2x16x64xf32>
    %81 = vector.shape_cast %80 : vector<2x16x64xf32> to vector<32x64xf32>
    %c128 = arith.constant 128 : index
    %c0_73 = arith.constant 0 : index
    %82 = vector.load %arg5[%c128, %c0_73] : memref<192x128xf32, #tpu.memory_space<vmem>>, vector<64x128xf32>
    %cst_74 = arith.constant dense<0.000000e+00> : vector<32x128xf32>
    %83 = tpu.matmul %81, %82, %cst_74 {dimension_numbers = #tpu.dot_dimension_numbers<[1], [0], [0], [1], [0, 0, 1, 1], [], []>} : vector<32x64xf32>, vector<64x128xf32>, vector<32x128xf32> -> vector<32x128xf32>
    %84 = arith.addf %79, %83 : vector<32x128xf32>
    %cst_75 = arith.constant dense<0.000000e+00> : vector<128xf32>
    %85 = vector.multi_reduction <add>, %84, %cst_75 [0] : vector<32x128xf32> to vector<128xf32>
    %86 = vector.shape_cast %85 : vector<128xf32> to vector<1x128xf32>
    %cst_76 = arith.constant 3.200000e+01 : f32
    %87 = vector.broadcast %cst_76 : f32 to vector<1x128xf32>
    %88 = arith.divf %86, %87 : vector<1x128xf32>
    %89 = vector.broadcast %88 : vector<1x128xf32> to vector<32x128xf32>
    %90 = arith.subf %84, %89 : vector<32x128xf32>
    %91 = arith.mulf %90, %90 : vector<32x128xf32>
    %cst_77 = arith.constant dense<0.000000e+00> : vector<128xf32>
    %92 = vector.multi_reduction <add>, %91, %cst_77 [0] : vector<32x128xf32> to vector<128xf32>
    %93 = vector.shape_cast %92 : vector<128xf32> to vector<1x128xf32>
    %cst_78 = arith.constant 3.200000e+01 : f32
    %94 = vector.broadcast %cst_78 : f32 to vector<1x128xf32>
    %95 = arith.divf %93, %94 : vector<1x128xf32>
    %96 = vector.broadcast %88 : vector<1x128xf32> to vector<32x128xf32>
    %97 = arith.subf %84, %96 : vector<32x128xf32>
    %cst_79 = arith.constant 9.99999974E-6 : f32
    %98 = vector.broadcast %cst_79 : f32 to vector<1x128xf32>
    %99 = arith.addf %95, %98 : vector<1x128xf32>
    %100 = math.rsqrt %99 : vector<1x128xf32>
    %101 = vector.broadcast %100 : vector<1x128xf32> to vector<32x128xf32>
    %102 = arith.mulf %97, %101 : vector<32x128xf32>
    %c0_80 = arith.constant 0 : index
    %c0_81 = arith.constant 0 : index
    %103 = vector.load %arg6[%c0_80, %c0_81] : memref<1x128xf32, #tpu.memory_space<vmem>>, vector<1x128xf32>
    %104 = vector.broadcast %103 : vector<1x128xf32> to vector<32x128xf32>
    %105 = arith.mulf %102, %104 : vector<32x128xf32>
    %c0_82 = arith.constant 0 : index
    %c0_83 = arith.constant 0 : index
    %106 = vector.load %arg7[%c0_82, %c0_83] : memref<1x128xf32, #tpu.memory_space<vmem>>, vector<1x128xf32>
    %107 = vector.broadcast %106 : vector<1x128xf32> to vector<32x128xf32>
    %108 = arith.addf %105, %107 : vector<32x128xf32>
    %cst_84 = arith.constant 0.000000e+00 : f32
    %109 = vector.broadcast %cst_84 : f32 to vector<32x128xf32>
    %110 = arith.cmpf ogt, %108, %109 : vector<32x128xf32>
    %cst_85 = arith.constant 1.000000e-01 : f32
    %111 = vector.broadcast %cst_85 : f32 to vector<32x128xf32>
    %112 = arith.mulf %111, %108 : vector<32x128xf32>
    %113 = arith.select %110, %108, %112 : vector<32x128xi1>, vector<32x128xf32>
    %114 = vector.shape_cast %113 : vector<32x128xf32> to vector<2x16x128xf32>
    %cst_86 = arith.constant 0.000000e+00 : f32
    %115 = vector.broadcast %cst_86 : f32 to vector<2x1x128xf32>
    %c0_87 = arith.constant 0 : index
    %c0_88 = arith.constant 0 : index
    %c0_89 = arith.constant 0 : index
    %116 = vector.load %arg15[%c0_87, %c0_88, %c0_89] : memref<2x18x128xf32, #tpu.memory_space<vmem>>, vector<2x1x128xf32>
    tpu.vector_store %arg15[%c0_87, %c0_88, %c0_89], %115 {strides = array<i32>} : memref<2x18x128xf32, #tpu.memory_space<vmem>>, vector<2x1x128xf32>,
    %c0_90 = arith.constant 0 : index
    %c17_91 = arith.constant 17 : index
    %c0_92 = arith.constant 0 : index
    %117 = vector.load %arg15[%c0_90, %c17_91, %c0_92] : memref<2x18x128xf32, #tpu.memory_space<vmem>>, vector<2x1x128xf32>
    tpu.vector_store %arg15[%c0_90, %c17_91, %c0_92], %115 {strides = array<i32>} : memref<2x18x128xf32, #tpu.memory_space<vmem>>, vector<2x1x128xf32>,
    %c0_93 = arith.constant 0 : index
    %c1_94 = arith.constant 1 : index
    %c0_95 = arith.constant 0 : index
    %118 = vector.load %arg15[%c0_93, %c1_94, %c0_95] : memref<2x18x128xf32, #tpu.memory_space<vmem>>, vector<2x16x128xf32>
    tpu.vector_store %arg15[%c0_93, %c1_94, %c0_95], %114 {strides = array<i32>} : memref<2x18x128xf32, #tpu.memory_space<vmem>>, vector<2x16x128xf32>,
    %c0_96 = arith.constant 0 : index
    %c0_97 = arith.constant 0 : index
    %c0_98 = arith.constant 0 : index
    %119 = vector.load %arg15[%c0_96, %c0_97, %c0_98] : memref<2x18x128xf32, #tpu.memory_space<vmem>>, vector<2x16x128xf32>
    %120 = vector.shape_cast %119 : vector<2x16x128xf32> to vector<32x128xf32>
    %c0_99 = arith.constant 0 : index
    %c1_100 = arith.constant 1 : index
    %c0_101 = arith.constant 0 : index
    %121 = vector.load %arg15[%c0_99, %c1_100, %c0_101] : memref<2x18x128xf32, #tpu.memory_space<vmem>>, vector<2x16x128xf32>
    %122 = vector.shape_cast %121 : vector<2x16x128xf32> to vector<32x128xf32>
    %c0_102 = arith.constant 0 : index
    %c2_103 = arith.constant 2 : index
    %c0_104 = arith.constant 0 : index
    %123 = vector.load %arg15[%c0_102, %c2_103, %c0_104] : memref<2x18x128xf32, #tpu.memory_space<vmem>>, vector<2x16x128xf32>
    %124 = vector.shape_cast %123 : vector<2x16x128xf32> to vector<32x128xf32>
    %125 = tpu.concatenate %120, %122, %124 in 1 : vector<32x128xf32>, vector<32x128xf32>, vector<32x128xf32> -> vector<32x384xf32>
    %c0_105 = arith.constant 0 : index
    %c0_106 = arith.constant 0 : index
    %126 = vector.load %arg8[%c0_105, %c0_106] : memref<384x256xf32, #tpu.memory_space<vmem>>, vector<384x256xf32>
    %cst_107 = arith.constant dense<0.000000e+00> : vector<32x256xf32>
    %127 = tpu.matmul %125, %126, %cst_107 {dimension_numbers = #tpu.dot_dimension_numbers<[1], [0], [0], [1], [0, 0, 1, 1], [], []>} : vector<32x384xf32>, vector<384x256xf32>, vector<32x256xf32> -> vector<32x256xf32>
    %cst_108 = arith.constant dense<0.000000e+00> : vector<256xf32>
    %128 = vector.multi_reduction <add>, %127, %cst_108 [0] : vector<32x256xf32> to vector<256xf32>
    %129 = vector.shape_cast %128 : vector<256xf32> to vector<1x256xf32>
    %cst_109 = arith.constant 3.200000e+01 : f32
    %130 = vector.broadcast %cst_109 : f32 to vector<1x256xf32>
    %131 = arith.divf %129, %130 : vector<1x256xf32>
    %132 = vector.broadcast %131 : vector<1x256xf32> to vector<32x256xf32>
    %133 = arith.subf %127, %132 : vector<32x256xf32>
    %134 = arith.mulf %133, %133 : vector<32x256xf32>
    %cst_110 = arith.constant dense<0.000000e+00> : vector<256xf32>
    %135 = vector.multi_reduction <add>, %134, %cst_110 [0] : vector<32x256xf32> to vector<256xf32>
    %136 = vector.shape_cast %135 : vector<256xf32> to vector<1x256xf32>
    %cst_111 = arith.constant 3.200000e+01 : f32
    %137 = vector.broadcast %cst_111 : f32 to vector<1x256xf32>
    %138 = arith.divf %136, %137 : vector<1x256xf32>
    %139 = vector.broadcast %131 : vector<1x256xf32> to vector<32x256xf32>
    %140 = arith.subf %127, %139 : vector<32x256xf32>
    %cst_112 = arith.constant 9.99999974E-6 : f32
    %141 = vector.broadcast %cst_112 : f32 to vector<1x256xf32>
    %142 = arith.addf %138, %141 : vector<1x256xf32>
    %143 = math.rsqrt %142 : vector<1x256xf32>
    %144 = vector.broadcast %143 : vector<1x256xf32> to vector<32x256xf32>
    %145 = arith.mulf %140, %144 : vector<32x256xf32>
    %c0_113 = arith.constant 0 : index
    %c0_114 = arith.constant 0 : index
    %146 = vector.load %arg9[%c0_113, %c0_114] : memref<1x256xf32, #tpu.memory_space<vmem>>, vector<1x256xf32>
    %147 = vector.broadcast %146 : vector<1x256xf32> to vector<32x256xf32>
    %148 = arith.mulf %145, %147 : vector<32x256xf32>
    %c0_115 = arith.constant 0 : index
    %c0_116 = arith.constant 0 : index
    %149 = vector.load %arg10[%c0_115, %c0_116] : memref<1x256xf32, #tpu.memory_space<vmem>>, vector<1x256xf32>
    %150 = vector.broadcast %149 : vector<1x256xf32> to vector<32x256xf32>
    %151 = arith.addf %148, %150 : vector<32x256xf32>
    %cst_117 = arith.constant 0.000000e+00 : f32
    %152 = vector.broadcast %cst_117 : f32 to vector<32x256xf32>
    %153 = arith.cmpf ogt, %151, %152 : vector<32x256xf32>
    %cst_118 = arith.constant 1.000000e-01 : f32
    %154 = vector.broadcast %cst_118 : f32 to vector<32x256xf32>
    %155 = arith.mulf %154, %151 : vector<32x256xf32>
    %156 = arith.select %153, %151, %155 : vector<32x256xi1>, vector<32x256xf32>
    %157 = vector.shape_cast %156 : vector<32x256xf32> to vector<2x16x256xf32>
    %cst_119 = arith.constant 0.000000e+00 : f32
    %158 = vector.broadcast %cst_119 : f32 to vector<2x1x256xf32>
    %c0_120 = arith.constant 0 : index
    %c0_121 = arith.constant 0 : index
    %c0_122 = arith.constant 0 : index
    %159 = vector.load %arg16[%c0_120, %c0_121, %c0_122] : memref<2x18x256xf32, #tpu.memory_space<vmem>>, vector<2x1x256xf32>
    tpu.vector_store %arg16[%c0_120, %c0_121, %c0_122], %158 {strides = array<i32>} : memref<2x18x256xf32, #tpu.memory_space<vmem>>, vector<2x1x256xf32>,
    %c0_123 = arith.constant 0 : index
    %c17_124 = arith.constant 17 : index
    %c0_125 = arith.constant 0 : index
    %160 = vector.load %arg16[%c0_123, %c17_124, %c0_125] : memref<2x18x256xf32, #tpu.memory_space<vmem>>, vector<2x1x256xf32>
    tpu.vector_store %arg16[%c0_123, %c17_124, %c0_125], %158 {strides = array<i32>} : memref<2x18x256xf32, #tpu.memory_space<vmem>>, vector<2x1x256xf32>,
    %c0_126 = arith.constant 0 : index
    %c1_127 = arith.constant 1 : index
    %c0_128 = arith.constant 0 : index
    %161 = vector.load %arg16[%c0_126, %c1_127, %c0_128] : memref<2x18x256xf32, #tpu.memory_space<vmem>>, vector<2x16x256xf32>
    tpu.vector_store %arg16[%c0_126, %c1_127, %c0_128], %157 {strides = array<i32>} : memref<2x18x256xf32, #tpu.memory_space<vmem>>, vector<2x16x256xf32>,
    %cst_129 = arith.constant 0.000000e+00 : f32
    %162 = vector.broadcast %cst_129 : f32 to vector<2x13xf32>
    %c0_130 = arith.constant 0 : index
    %c1_131 = arith.constant 1 : index
    %c0_132 = arith.constant 0 : index
    %163 = vector.load %arg16[%c0_130, %c1_131, %c0_132] : memref<2x18x256xf32, #tpu.memory_space<vmem>>, vector<2x13x256xf32>
    %c0_133 = arith.constant 0 : index
    %c0_134 = arith.constant 0 : index
    %164 = vector.load %arg11[%c0_133, %c0_134] : memref<4x256xf32, #tpu.memory_space<vmem>>, vector<1x256xf32>
    %165 = vector.shape_cast %164 : vector<1x256xf32> to vector<1x1x256xf32>
    %166 = vector.broadcast %165 : vector<1x1x256xf32> to vector<2x13x256xf32>
    %167 = arith.mulf %163, %166 : vector<2x13x256xf32>
    %cst_135 = arith.constant dense<0.000000e+00> : vector<2x13xf32>
    %168 = vector.multi_reduction <add>, %167, %cst_135 [2] : vector<2x13x256xf32> to vector<2x13xf32>
    %169 = arith.addf %162, %168 : vector<2x13xf32>
    %c0_136 = arith.constant 0 : index
    %c2_137 = arith.constant 2 : index
    %c0_138 = arith.constant 0 : index
    %170 = vector.load %arg16[%c0_136, %c2_137, %c0_138] : memref<2x18x256xf32, #tpu.memory_space<vmem>>, vector<2x13x256xf32>
    %c1_139 = arith.constant 1 : index
    %c0_140 = arith.constant 0 : index
    %171 = vector.load %arg11[%c1_139, %c0_140] : memref<4x256xf32, #tpu.memory_space<vmem>>, vector<1x256xf32>
    %172 = vector.shape_cast %171 : vector<1x256xf32> to vector<1x1x256xf32>
    %173 = vector.broadcast %172 : vector<1x1x256xf32> to vector<2x13x256xf32>
    %174 = arith.mulf %170, %173 : vector<2x13x256xf32>
    %cst_141 = arith.constant dense<0.000000e+00> : vector<2x13xf32>
    %175 = vector.multi_reduction <add>, %174, %cst_141 [2] : vector<2x13x256xf32> to vector<2x13xf32>
    %176 = arith.addf %169, %175 : vector<2x13xf32>
    %c0_142 = arith.constant 0 : index
    %c3 = arith.constant 3 : index
    %c0_143 = arith.constant 0 : index
    %177 = vector.load %arg16[%c0_142, %c3, %c0_143] : memref<2x18x256xf32, #tpu.memory_space<vmem>>, vector<2x13x256xf32>
    %c2_144 = arith.constant 2 : index
    %c0_145 = arith.constant 0 : index
    %178 = vector.load %arg11[%c2_144, %c0_145] : memref<4x256xf32, #tpu.memory_space<vmem>>, vector<1x256xf32>
    %179 = vector.shape_cast %178 : vector<1x256xf32> to vector<1x1x256xf32>
    %180 = vector.broadcast %179 : vector<1x1x256xf32> to vector<2x13x256xf32>
    %181 = arith.mulf %177, %180 : vector<2x13x256xf32>
    %cst_146 = arith.constant dense<0.000000e+00> : vector<2x13xf32>
    %182 = vector.multi_reduction <add>, %181, %cst_146 [2] : vector<2x13x256xf32> to vector<2x13xf32>
    %183 = arith.addf %176, %182 : vector<2x13xf32>
    %c0_147 = arith.constant 0 : index
    %c4 = arith.constant 4 : index
    %c0_148 = arith.constant 0 : index
    %184 = vector.load %arg16[%c0_147, %c4, %c0_148] : memref<2x18x256xf32, #tpu.memory_space<vmem>>, vector<2x13x256xf32>
    %c3_149 = arith.constant 3 : index
    %c0_150 = arith.constant 0 : index
    %185 = vector.load %arg11[%c3_149, %c0_150] : memref<4x256xf32, #tpu.memory_space<vmem>>, vector<1x256xf32>
    %186 = vector.shape_cast %185 : vector<1x256xf32> to vector<1x1x256xf32>
    %187 = vector.broadcast %186 : vector<1x1x256xf32> to vector<2x13x256xf32>
    %188 = arith.mulf %184, %187 : vector<2x13x256xf32>
    %cst_151 = arith.constant dense<0.000000e+00> : vector<2x13xf32>
    %189 = vector.multi_reduction <add>, %188, %cst_151 [2] : vector<2x13x256xf32> to vector<2x13xf32>
    %190 = arith.addf %183, %189 : vector<2x13xf32>
    %191 = arith.negf %190 : vector<2x13xf32>
    %192 = math.exp %191 : vector<2x13xf32>
    %cst_152 = arith.constant 1.000000e+00 : f32
    %193 = vector.broadcast %cst_152 : f32 to vector<2x13xf32>
    %194 = arith.addf %193, %192 : vector<2x13xf32>
    %195 = arith.divf %193, %194 : vector<2x13xf32>
    %c0_153 = arith.constant 0 : index
    %c0_154 = arith.constant 0 : index
    %196 = vector.load %arg12[%c0_153, %c0_154] : memref<2x13xf32, #tpu.memory_space<vmem>>, vector<2x13xf32>
    tpu.vector_store %arg12[%c0_153, %c0_154], %195 {strides = array<i32>} : memref<2x13xf32, #tpu.memory_space<vmem>>, vector<2x13xf32>,
    return
  }
}

</mosaic_0001>

<bundles_post_ra>
// kernel: discriminator_forward.1
= control target key start
LH: loop header
LB: loop body
LE: loop exit
PB: predicated region body
PF: predicated region fallthrough
CT: control target
= control target key end

     0   :  { %s3932_s0 = inlined_call_operand.vmem [shape: f32[2,18,256], index: 0, kind: input, shape index: {}]   ;;  %s3933_s1 = inlined_call_operand.vmem [shape: f32[768,32], index: 1, kind: input, shape index: {}]   ;;  %s3934_s2 = inlined_call_operand.vmem [shape: f32[96,64], index: 2, kind: input, shape index: {}]   ;;  %s3935_s3 = inlined_call_operand.vmem [shape: f32[1,64], index: 3, kind: input, shape index: {}]   ;;  %s3936_s4 = inlined_call_operand.vmem [shape: f32[1,64], index: 4, kind: input, shape index: {}]   ;;  %s3937_s5 = inlined_call_operand.vmem [shape: f32[192,128], index: 5, kind: input, shape index: {}]   ;;  %s3938_s6 = inlined_call_operand.vmem [shape: f32[1,128], index: 6, kind: input, shape index: {}]   ;;  %s3939_s7 = inlined_call_operand.vmem [shape: f32[1,128], index: 7, kind: input, shape index: {}]   ;;  %s3940_s8 = inlined_call_operand.vmem [shape: f32[384,256], index: 8, kind: input, shape index: {}]   ;;  %s3941_s9 = inlined_call_operand.vmem [shape: f32[1,256], index: 9, kind: input, shape index: {}]   ;;  %s3942_s10 = inlined_call_operand.vmem [shape: f32[1,256], index: 10, kind: input, shape index: {}]   ;;  %s3943_s11 = inlined_call_operand.vmem [shape: f32[4,256], index: 11, kind: input, shape index: {}]   ;;  %s3944_s12 = inlined_call_operand.hbm [shape: f32[2,13], index: 12, kind: output, shape index: {}]  }
   0x1   :  { %v160_v0 = vld [vmem:[%s3933_s1 + $0x80] sm:$0xff]  ;;  %v161_v1 = vld [vmem:[%s3933_s1 + $0x88] sm:$0xff]  ;;  %v162_v5 = vld [vmem:[%s3933_s1 + $0x90] sm:$0xff] }
   0x2   :  { %v144_v2 = vld [vmem:[%s3933_s1] sm:$0xff]  ;;  %v2495_v3 = vpack.c.bf16 %v161_v1, %v160_v0  ;;  %v145_v4 = vld [vmem:[%s3933_s1 + $0x8] sm:$0xff]  ;;  %v163_v6 = vld [vmem:[%s3933_s1 + $0x98] sm:$0xff] }
   0x3   :  { %v2497_v7 = vpack.c.bf16 %v145_v4, %v144_v2  ;;  %v2499_v8 = vpack.c.bf16 %v163_v6, %v162_v5  ;;  %v146_v9 = vld [vmem:[%s3933_s1 + $0x10] sm:$0xff]  ;;  %v147_v10 = vld [vmem:[%s3933_s1 + $0x18] sm:$0xff]  ;;  %v164_v11 = vld [vmem:[%s3933_s1 + $0xa0] sm:$0xff] }
   0x4   :  { %2496 = vmatprep.subr.bf16.mxu0 %v2495_v3  ;;  %v165_v12 = vld [vmem:[%s3933_s1 + $0xa8] sm:$0xff]  ;;  %v2501_v13 = vpack.c.bf16 %v147_v10, %v146_v9  ;;  %v148_v15 = vld [vmem:[%s3933_s1 + $0x20] sm:$0xff]  ;;  %v166_v17 = vld [vmem:[%s3933_s1 + $0xb0] sm:$0xff] }
   0x5   :  { %2498 = vmatpush3.bf16.msra.mxu0 %v2497_v7  ;;  %v2503_v14 = vpack.c.bf16 %v165_v12, %v164_v11  ;;  %v149_v16 = vld [vmem:[%s3933_s1 + $0x28] sm:$0xff]  ;;  %v167_v18 = vld [vmem:[%s3933_s1 + $0xb8] sm:$0xff]  ;;  %v150_v21 = vld [vmem:[%s3933_s1 + $0x30] sm:$0xff] }
   0x6   :  { %2500 = vmatprep.subr.bf16.mxu0 %v2499_v8  ;;  %v2505_v19 = vpack.c.bf16 %v149_v16, %v148_v15  ;;  %v2507_v20 = vpack.c.bf16 %v167_v18, %v166_v17  ;;  %v151_v22 = vld [vmem:[%s3933_s1 + $0x38] sm:$0xff]  ;;  %v168_v23 = vld [vmem:[%s3933_s1 + $0xc0] sm:$0xff]  ;;  %v169_v24 = vld [vmem:[%s3933_s1 + $0xc8] sm:$0xff] }
   0x7   :  { %v43_v25 = vld [vmem:[%s3932_s0 + $0x8] sm:$0xff]  ;;  %v2509_v26 = vpack.c.bf16 %v151_v22, %v150_v21  ;;  %v2511_v27 = vpack.c.bf16 %v169_v24, %v168_v23  ;;  %v152_v28 = vld [vmem:[%s3933_s1 + $0x40] sm:$0xff]  ;;  %v170_v30 = vld [vmem:[%s3933_s1 + $0xd0] sm:$0xff] }
   0x8   :  { %304 = vmatprep.mubr.f32.mxu0 %v43_v25  ;;  %v153_v29 = vld [vmem:[%s3933_s1 + $0x48] sm:$0xff]  ;;  %v171_v31 = vld [vmem:[%s3933_s1 + $0xd8] sm:$0xff]  ;;  %v154_v34 = vld [vmem:[%s3933_s1 + $0x50] sm:$0xff] }
   0x9   :  { %2502 = vmatpush3.bf16.msra.mxu0 %v2501_v13  ;;  %v2513_v32 = vpack.c.bf16 %v153_v29, %v152_v28  ;;  %v2515_v33 = vpack.c.bf16 %v171_v31, %v170_v30  ;;  %v155_v35 = vld [vmem:[%s3933_s1 + $0x58] sm:$0xff]  ;;  %v172_v36 = vld [vmem:[%s3933_s1 + $0xe0] sm:$0xff]  ;;  %v173_v37 = vld [vmem:[%s3933_s1 + $0xe8] sm:$0xff] }
   0xa   :  { %2504 = vmatprep.subr.bf16.mxu0 %v2503_v14  ;;  %v2517_v38 = vpack.c.bf16 %v155_v35, %v154_v34  ;;  %v2519_v39 = vpack.c.bf16 %v173_v37, %v172_v36  ;;  %v156_v40 = vld [vmem:[%s3933_s1 + $0x60] sm:$0xff]  ;;  %v157_v41 = vld [vmem:[%s3933_s1 + $0x68] sm:$0xff]  ;;  %v174_v42 = vld [vmem:[%s3933_s1 + $0xf0] sm:$0xff] }
   0xb   :  { %v175_v43 = vld [vmem:[%s3933_s1 + $0xf8] sm:$0xff]  ;;  %v2521_v44 = vpack.c.bf16 %v157_v41, %v156_v40  ;;  %v158_v46 = vld [vmem:[%s3933_s1 + $0x70] sm:$0xff]  ;;  %v192_v48 = vld [vmem:[%s3933_s1 + $0x180] sm:$0xff] }
   0xc   :  { %v2523_v45 = vpack.c.bf16 %v175_v43, %v174_v42  ;;  %v159_v47 = vld [vmem:[%s3933_s1 + $0x78] sm:$0xff]  ;;  %v193_v49 = vld [vmem:[%s3933_s1 + $0x188] sm:$0xff]  ;;  %v176_v52 = vld [vmem:[%s3933_s1 + $0x100] sm:$0xff] }
   0xd   :  { %2506 = vmatpush3.bf16.msra.mxu0 %v2505_v19  ;;  %v2525_v50 = vpack.c.bf16 %v159_v47, %v158_v46  ;;  %v2527_v51 = vpack.c.bf16 %v193_v49, %v192_v48  ;;  %v177_v53 = vld [vmem:[%s3933_s1 + $0x108] sm:$0xff]  ;;  %v194_v54 = vld [vmem:[%s3933_s1 + $0x190] sm:$0xff]  ;;  %v195_v55 = vld [vmem:[%s3933_s1 + $0x198] sm:$0xff] }
   0xe   :  { %2508 = vmatprep.subr.bf16.mxu0 %v2507_v20  ;;  %v42_v56 = vld [vmem:[%s3932_s0] sm:$0xff]  ;;  %v2529_v57 = vpack.c.bf16 %v177_v53, %v176_v52  ;;  %v2531_v58 = vpack.c.bf16 %v195_v55, %v194_v54  ;;  %v178_v59 = vld [vmem:[%s3933_s1 + $0x110] sm:$0xff]  ;;  %v179_v60 = vld [vmem:[%s3933_s1 + $0x118] sm:$0xff] }
   0xf   :  { %v3033_v61 = vld [vmem:[%s3932_s0 + $0x18] sm:$0xff]  ;;  %v196_v62 = vld [vmem:[%s3933_s1 + $0x1a0] sm:$0xff]  ;;  %v197_v63 = vld [vmem:[%s3933_s1 + $0x1a8] sm:$0xff]  ;;  %v2533_v0 = vpack.c.bf16 %v179_v60, %v178_v59 }
  0x10   :  { %v3045_v1 = vld [vmem:[%s3932_s0 + $0x10] sm:$0xff]  ;;  %v2535_v2 = vpack.c.bf16 %v197_v63, %v196_v62  ;;  %v180_v3 = vld [vmem:[%s3933_s1 + $0x120] sm:$0xff]  ;;  %v181_v4 = vld [vmem:[%s3933_s1 + $0x128] sm:$0xff]  ;;  %v75_v14 = vrot.slane %v3033_v61, 1 }
  0x11   :  { %2510 = vmatpush3.bf16.msra.mxu0 %v2509_v26  ;;  %v47_v5 = vld [vmem:[%s3932_s0 + $0x38] sm:$0xff]  ;;  %v198_v6 = vld [vmem:[%s3933_s1 + $0x1b0] sm:$0xff]  ;;  %v51_v8 = vld [vmem:[%s3932_s0 + $0x8] sm:$0xfe]  ;;  %v2537_v9 = vpack.c.bf16 %v181_v4, %v180_v3 }
  0x12   :  { %2512 = vmatprep.subr.bf16.mxu0 %v2511_v27  ;;  %v199_v7 = vld [vmem:[%s3933_s1 + $0x1b8] sm:$0xff]  ;;  %v182_v10 = vld [vmem:[%s3933_s1 + $0x130] sm:$0xff]  ;;  %v3079_v15 = vld [vmem:[%s3932_s0 + $0x48] sm:$0xff]  ;;  %v74_v16 = vrot.slane %v51_v8, 1 }
  0x13   :  { %v46_v11 = vld [vmem:[%s3932_s0 + $0x30] sm:$0xff]  ;;  %v2539_v12 = vpack.c.bf16 %v199_v7, %v198_v6  ;;  %v183_v13 = vld [vmem:[%s3933_s1 + $0x138] sm:$0xff] }
  0x15   :  { %2514 = vmatpush3.bf16.msra.mxu0 %v2513_v32 }
  0x16   :  { %2516 = vmatprep.subr.bf16.mxu0 %v2515_v33 }
  0x19   :  { %2518 = vmatpush3.bf16.msra.mxu0 %v2517_v38 }
  0x1a   :  { %2520 = vmatprep.subr.bf16.mxu0 %v2519_v39 }
  0x1d   :  { %2522 = vmatpush3.bf16.msra.mxu0 %v2521_v44 }
  0x1e   :  { %2524 = vmatprep.subr.bf16.mxu0 %v2523_v45 }
  0x21   :  { %2526 = vmatpush3.bf16.msra.mxu0 %v2525_v50 }
  0x22   :  { %2528 = vmatprep.subr.bf16.mxu0 %v2527_v51 }
  0x24   :  { %305 = vmatmul.mubr.f32.vlgmr.msra.gmra.mrb[0].mxu0 %v42_v56 }
  0x25   :  { %2530 = vmatpush3.bf16.msra.mxu0 %v2529_v57  ;;  %309 = vmatprep.mubr.f32.mxu0 %v3033_v61 }
  0x26   :  { %2532 = vmatprep.subr.bf16.mxu0 %v2531_v58 }
  0x28   :  { %310 = vmatmul.mubr.f32.gmra.mrb[2].mxu0 %v3045_v1 }
  0x29   :  { %2534 = vmatpush3.bf16.msra.mxu0 %v2533_v0  ;;  %314 = vmatprep.mubr.f32.mxu0 %v47_v5 }
  0x2a   :  { %2536 = vmatprep.subr.bf16.mxu0 %v2535_v2 }
  0x2b   :  { %17 = vsyncpa [#allocation7], 0  ;;  %v200_v17 = vld [vmem:[%s3933_s1 + $0x1c0] sm:$0xff]  ;;  %v201_v18 = vld [vmem:[%s3933_s1 + $0x1c8] sm:$0xff]  ;;  %vm70_vm0 = vcmask 1046528   ;;  %v2541_v19 = vpack.c.bf16 %v183_v13, %v182_v10  ;;  %v72_v47 = vrot.slane %v3045_v1, 1 }
  0x2c   :  { %315 = vmatmul.mubr.f32.gmra.mrb[4].mxu0 %v46_v11  ;;  %v3091_v20 = vld [vmem:[%s3932_s0 + $0x40] sm:$0xff]  ;;  %v2543_v21 = vpack.c.bf16 %v201_v18, %v200_v17  ;;  %v185_v23 = vld [vmem:[%s3933_s1 + $0x148] sm:$0xff]  ;;  %v76_v24 = vsel %vm70_vm0, %v74_v16, %v75_v14  ;;  %v202_v25 = vld [vmem:[%s3933_s1 + $0x1d0] sm:$0xff]  ;;  %v85_v62 = vrot.slane %v3079_v15, 1  ;;  %vm115_vm1 = vcmask 1045504  }
  0x2d   :  { %2538 = vmatpush3.bf16.msra.mxu0 %v2537_v9  ;;  %319 = vmatprep.mubr.f32.mxu0 %v3079_v15  ;;  %v184_v22 = vld [vmem:[%s3933_s1 + $0x140] sm:$0xff]  ;;  %v203_v26 = vld [vmem:[%s3933_s1 + $0x1d8] sm:$0xff]  ;;  %v186_v29 = vld [vmem:[%s3933_s1 + $0x150] sm:$0xff]  ;;  %v82_v9 = vrot.slane %v3091_v20, 1  ;;  %vm507_vm2 = vcmask 253952   ;;  %vm512_vm4 = vcmask 261120  }
  0x2e   :  { %2540 = vmatprep.subr.bf16.mxu0 %v2539_v12  ;;  %v2545_v27 = vpack.c.bf16 %v185_v23, %v184_v22  ;;  %v2547_v28 = vpack.c.bf16 %v203_v26, %v202_v25  ;;  %v187_v30 = vld [vmem:[%s3933_s1 + $0x158] sm:$0xff]  ;;  %v204_v31 = vld [vmem:[%s3933_s1 + $0x1e0] sm:$0xff]  ;;  %v205_v32 = vld [vmem:[%s3933_s1 + $0x1e8] sm:$0xff]  ;;  %vm914_vm8 = vcmask 516096   ;;  %vm836_vm9 = vcmask 523264  }
  0x2f   :  { %v2549_v33 = vpack.c.bf16 %v187_v30, %v186_v29  ;;  %v2551_v34 = vpack.c.bf16 %v205_v32, %v204_v31  ;;  %v188_v35 = vld [vmem:[%s3933_s1 + $0x160] sm:$0xff]  ;;  %v189_v36 = vld [vmem:[%s3933_s1 + $0x168] sm:$0xff]  ;;  %v206_v37 = vld [vmem:[%s3933_s1 + $0x1f0] sm:$0xff] }
  0x30   :  { %320 = vmatmul.mubr.f32.gmra.mrb[6].mxu0 %v3091_v20  ;;  %v207_v38 = vld [vmem:[%s3933_s1 + $0x1f8] sm:$0xff]  ;;  %v2553_v39 = vpack.c.bf16 %v189_v36, %v188_v35  ;;  %v190_v41 = vld [vmem:[%s3933_s1 + $0x170] sm:$0xff]  ;;  %v50_v43 = vld [vmem:[%s3932_s0] sm:$0xfe] }
  0x31   :  { %2542 = vmatpush3.bf16.msra.mxu0 %v2541_v19  ;;  %389 = vmatprep.mubr.f32.mxu0 %v76_v24  ;;  %v2555_v40 = vpack.c.bf16 %v207_v38, %v206_v37  ;;  %v191_v42 = vld [vmem:[%s3933_s1 + $0x178] sm:$0xff]  ;;  %v224_v44 = vld [vmem:[%s3933_s1 + $0x280] sm:$0xff]  ;;  %v225_v45 = vld [vmem:[%s3933_s1 + $0x288] sm:$0xff]  ;;  %v71_v49 = vrot.slane %v50_v43, 1 }
  0x32   :  { %2544 = vmatprep.subr.bf16.mxu0 %v2543_v21  ;;  %v53_v46 = vld [vmem:[%s3932_s0 + $0x28] sm:$0x1]  ;;  %v2557_v48 = vpack.c.bf16 %v191_v42, %v190_v41  ;;  %v2559_v50 = vpack.c.bf16 %v225_v45, %v224_v44  ;;  %v208_v51 = vld [vmem:[%s3933_s1 + $0x200] sm:$0xff]  ;;  %v226_v55 = vld [vmem:[%s3933_s1 + $0x290] sm:$0xff] }
  0x33   :  { %v209_v52 = vld [vmem:[%s3933_s1 + $0x208] sm:$0xff]  ;;  %v79_v53 = vrot.slane %v53_v46, 1  ;;  %v52_v54 = vld [vmem:[%s3932_s0 + $0x20] sm:$0x1]  ;;  %v227_v56 = vld [vmem:[%s3933_s1 + $0x298] sm:$0xff]  ;;  %v73_v58 = vsel %vm70_vm0, %v71_v49, %v72_v47 }
  0x34   :  { %v55_v57 = vld [vmem:[%s3932_s0 + $0x38] sm:$0xfe]  ;;  %v2561_v59 = vpack.c.bf16 %v209_v52, %v208_v51  ;;  %v77_v60 = vrot.slane %v52_v54, 1  ;;  %v2563_v0 = vpack.c.bf16 %v227_v56, %v226_v55  ;;  %v210_v2 = vld [vmem:[%s3933_s1 + $0x210] sm:$0xff]  ;;  %v228_v6 = vld [vmem:[%s3933_s1 + $0x2a0] sm:$0xff] }
  0x35   :  { %2546 = vmatpush3.bf16.msra.mxu0 %v2545_v27  ;;  %v80_v63 = vsel %vm70_vm0, %v75_v14, %v79_v53  ;;  %v211_v3 = vld [vmem:[%s3933_s1 + $0x218] sm:$0xff]  ;;  %v84_v4 = vrot.slane %v55_v57, 1  ;;  %v54_v5 = vld [vmem:[%s3932_s0 + $0x30] sm:$0xfe]  ;;  %v229_v7 = vld [vmem:[%s3933_s1 + $0x2a8] sm:$0xff]  ;;  %v120_v27 = vrot.slane %v3033_v61, 2 }
  0x36   :  { %2548 = vmatprep.subr.bf16.mxu0 %v2547_v28  ;;  %v57_v8 = vld [vmem:[%s3932_s0 + $0x58] sm:$0x1]  ;;  %v78_v10 = vsel %vm70_vm0, %v72_v47, %v77_v60  ;;  %v2565_v11 = vpack.c.bf16 %v211_v3, %v210_v2  ;;  %v81_v12 = vrot.slane %v54_v5, 1  ;;  %v2567_v14 = vpack.c.bf16 %v229_v7, %v228_v6  ;;  %v212_v16 = vld [vmem:[%s3933_s1 + $0x220] sm:$0xff]  ;;  %v213_v17 = vld [vmem:[%s3933_s1 + $0x228] sm:$0xff] }
  0x37   :  { %v86_v13 = vsel %vm70_vm0, %v84_v4, %v85_v62  ;;  %v89_v18 = vrot.slane %v57_v8, 1  ;;  %v56_v19 = vld [vmem:[%s3932_s0 + $0x50] sm:$0x1]  ;;  %v231_v22 = vld [vmem:[%s3933_s1 + $0x2b8] sm:$0xff]  ;;  %v100_v23 = vld [vmem:[%s3932_s0 + $0x8] sm:$0xfc]  ;;  %v2569_v25 = vpack.c.bf16 %v213_v17, %v212_v16 }
  0x38   :  { %v230_v21 = vld [vmem:[%s3933_s1 + $0x2b0] sm:$0xff]  ;;  %v83_v24 = vsel %vm70_vm0, %v81_v12, %v82_v9  ;;  %v87_v26 = vrot.slane %v56_v19, 1  ;;  %v215_v31 = vld [vmem:[%s3933_s1 + $0x238] sm:$0xff]  ;;  %v119_v32 = vrot.slane %v100_v23, 2  ;;  %v233_v61 = vld [vmem:[%s3933_s1 + $0x2c8] sm:$0xff]  ;;  %v117_v60 = vrot.slane %v3045_v1, 2 }
  0x39   :  { %2550 = vmatpush3.bf16.msra.mxu0 %v2549_v33  ;;  %v90_v28 = vsel %vm70_vm0, %v85_v62, %v89_v18  ;;  %v2571_v29 = vpack.c.bf16 %v231_v22, %v230_v21  ;;  %v214_v30 = vld [vmem:[%s3933_s1 + $0x230] sm:$0xff]  ;;  %v232_v33 = vld [vmem:[%s3933_s1 + $0x2c0] sm:$0xff]  ;;  %v217_v38 = vld [vmem:[%s3933_s1 + $0x248] sm:$0xff]  ;;  %v130_v6 = vrot.slane %v3079_v15, 2  ;;  %v2836_v19 = vmov 0.0  }
  0x3a   :  { %2552 = vmatprep.subr.bf16.mxu0 %v2551_v34  ;;  %v88_v34 = vsel %vm70_vm0, %v82_v9, %v87_v26  ;;  %v2573_v35 = vpack.c.bf16 %v215_v31, %v214_v30  ;;  %v2575_v36 = vpack.c.bf16 %v233_v61, %v232_v33  ;;  %v216_v37 = vld [vmem:[%s3933_s1 + $0x240] sm:$0xff]  ;;  %v235_v41 = vld [vmem:[%s3933_s1 + $0x2d8] sm:$0xff]  ;;  %v218_v44 = vld [vmem:[%s3933_s1 + $0x250] sm:$0xff]  ;;  %508 = vst.msk [vmem:[#allocation2] sm:$0x1] %vm507_vm2, %v2836_v19 }
  0x3b   :  { %v2577_v42 = vpack.c.bf16 %v217_v38, %v216_v37  ;;  %v219_v45 = vld [vmem:[%s3933_s1 + $0x258] sm:$0xff]  ;;  %v236_v46 = vld [vmem:[%s3933_s1 + $0x2e0] sm:$0xff]  ;;  %v237_v47 = vld [vmem:[%s3933_s1 + $0x2e8] sm:$0xff]  ;;  %509 = vst.msk [vmem:[#allocation2 + $0x18] sm:$0x1] %vm507_vm2, %v2836_v19 }
  0x3c   :  { %v2583_v49 = vpack.c.bf16 %v237_v47, %v236_v46  ;;  %v221_v51 = vld [vmem:[%s3933_s1 + $0x268] sm:$0xff]  ;;  %v238_v52 = vld [vmem:[%s3933_s1 + $0x2f0] sm:$0xff]  ;;  %v239_v53 = vld [vmem:[%s3933_s1 + $0x2f8] sm:$0xff]  ;;  %510 = vst.msk [vmem:[#allocation2 + $0x11] sm:$0x1] %vm507_vm2, %v2836_v19 }
  0x3d   :  { %2554 = vmatpush3.bf16.msra.mxu0 %v2553_v39  ;;  %v121_v39 = vsel %vm115_vm1, %v119_v32, %v120_v27  ;;  %v2587_v55 = vpack.c.bf16 %v239_v53, %v238_v52  ;;  %v222_v56 = vld [vmem:[%s3933_s1 + $0x270] sm:$0xff]  ;;  %v223_v57 = vld [vmem:[%s3933_s1 + $0x278] sm:$0xff]  ;;  %v101_v2 = vld [vmem:[%s3932_s0 + $0x20] sm:$0x3]  ;;  %511 = vst.msk [vmem:[#allocation2 + $0x29] sm:$0x1] %vm507_vm2, %v2836_v19 }
  0x3e   :  { %2556 = vmatprep.subr.bf16.mxu0 %v2555_v40  ;;  %v234_v40 = vld [vmem:[%s3933_s1 + $0x2d0] sm:$0xff]  ;;  %v2589_v62 = vpack.c.bf16 %v223_v57, %v222_v56  ;;  %v104_v3 = vld [vmem:[%s3932_s0 + $0x38] sm:$0xfc]  ;;  %v122_v5 = vrot.slane %v101_v2, 2  ;;  %v106_v9 = vld [vmem:[%s3932_s0 + $0x58] sm:$0x3] }
  0x3f   :  { %v2579_v43 = vpack.c.bf16 %v235_v41, %v234_v40  ;;  %v129_v7 = vrot.slane %v104_v3, 2  ;;  %v103_v8 = vld [vmem:[%s3932_s0 + $0x30] sm:$0xfc]  ;;  %1322 = vst [vmem:[#allocation4] sm:$0x1] %v2836_v19  ;;  %v529_v21 = vld [vmem:[%s3934_s2 + $0x20] sm:$0xff] }
  0x40   :  { %v126_v12 = vrot.slane %v103_v8, 2  ;;  %1323 = vst [vmem:[#allocation4 + $0x18] sm:$0x1] %v2836_v19  ;;  %1324 = vst [vmem:[#allocation4 + $0x11] sm:$0x1] %v2836_v19  ;;  %v530_v22 = vld [vmem:[%s3934_s2 + $0x28] sm:$0xff] }
  0x41   :  { %2558 = vmatpush3.bf16.msra.mxu0 %v2557_v48  ;;  %v2581_v48 = vpack.c.bf16 %v219_v45, %v218_v44  ;;  %v131_v15 = vsel %vm115_vm1, %v129_v7, %v130_v6  ;;  %1325 = vst [vmem:[#allocation4 + $0x29] sm:$0x1] %v2836_v19  ;;  %v2591_v23 = vpack.c.bf16 %v530_v22, %v529_v21  ;;  %915 = vst.msk [vmem:[#allocation3] sm:$0x1] %vm914_vm8, %v2836_v19 }
  0x42   :  { %2560 = vmatprep.subr.bf16.mxu0 %v2559_v50  ;;  %v220_v50 = vld [vmem:[%s3933_s1 + $0x260] sm:$0xff]  ;;  %916 = vst.msk [vmem:[#allocation3 + $0x18] sm:$0x1] %vm914_vm8, %v2836_v19  ;;  %917 = vst.msk [vmem:[#allocation3 + $0x11] sm:$0x1] %vm914_vm8, %v2836_v19 }
  0x43   :  { %v2585_v54 = vpack.c.bf16 %v221_v51, %v220_v50  ;;  %2592 = vmatprep.subr.bf16.mxu1 %v2591_v23  ;;  %918 = vst.msk [vmem:[#allocation3 + $0x29] sm:$0x1] %vm914_vm8, %v2836_v19 }
  0x44   :  { %390 = vmatmul.mubr.f32.vlgmr.msra.gmra.mrb[8].mxu0 %v73_v58  ;;  %v99_v58 = vld [vmem:[%s3932_s0] sm:$0xfc]  ;;  %2594 = vmatpush3.bf16.msra.mxu1 %v2591_v23 }
  0x45   :  { %2562 = vmatpush3.bf16.msra.mxu0 %v2561_v59  ;;  %394 = vmatprep.mubr.f32.mxu0 %v80_v63  ;;  %v102_v59 = vld [vmem:[%s3932_s0 + $0x28] sm:$0x3]  ;;  %v116_v63 = vrot.slane %v99_v58, 2 }
  0x46   :  { %2564 = vmatprep.subr.bf16.mxu0 %v2563_v0  ;;  %v124_v0 = vrot.slane %v102_v59, 2 }
  0x47   :  { %v118_v4 = vsel %vm115_vm1, %v116_v63, %v117_v60 }
  0x48   :  { %395 = vmatmul.mubr.f32.gmra.mrb[10].mxu0 %v78_v10  ;;  %v125_v1 = vsel %vm115_vm1, %v120_v27, %v124_v0  ;;  %v127_v10 = vrot.slane %v3091_v20, 2  ;;  %v521_v27 = vld [vmem:[%s3934_s2] sm:$0xff] }
  0x49   :  { %2566 = vmatpush3.bf16.msra.mxu0 %v2565_v11  ;;  %399 = vmatprep.mubr.f32.mxu0 %v86_v13  ;;  %v123_v11 = vsel %vm115_vm1, %v117_v60, %v122_v5  ;;  %v134_v13 = vrot.slane %v106_v9, 2 }
  0x4a   :  { %2568 = vmatprep.subr.bf16.mxu0 %v2567_v14  ;;  %v105_v14 = vld [vmem:[%s3932_s0 + $0x50] sm:$0x3]  ;;  %v128_v16 = vsel %vm115_vm1, %v126_v12, %v127_v10 }
  0x4b   :  { %v132_v17 = vrot.slane %v105_v14, 2  ;;  %v135_v18 = vsel %vm115_vm1, %v130_v6, %v134_v13 }
  0x4c   :  { %400 = vmatmul.mubr.f32.gmra.mrb[12].mxu0 %v83_v24  ;;  %v531_v24 = vld [vmem:[%s3934_s2 + $0x30] sm:$0xff] }
  0x4d   :  { %2570 = vmatpush3.bf16.msra.mxu0 %v2569_v25  ;;  %404 = vmatprep.mubr.f32.mxu0 %v90_v28  ;;  %v133_v20 = vsel %vm115_vm1, %v127_v10, %v132_v17  ;;  %v532_v25 = vld [vmem:[%s3934_s2 + $0x38] sm:$0xff]  ;;  %v522_v28 = vld [vmem:[%s3934_s2 + $0x8] sm:$0xff]  ;;  %v523_v17 = vld [vmem:[%s3934_s2 + $0x10] sm:$0xff] }
  0x4e   :  { %2572 = vmatprep.subr.bf16.mxu0 %v2571_v29  ;;  %v2595_v26 = vpack.c.bf16 %v532_v25, %v531_v24  ;;  %v3330_v29 = vpack.c.bf16 %v522_v28, %v521_v27  ;;  %v731_v24 = vld [vmem:[%s3934_s2 + $0x40] sm:$0xff]  ;;  %v732_v25 = vld [vmem:[%s3934_s2 + $0x48] sm:$0xff] }
  0x50   :  { %405 = vmatmul.mubr.f32.gmra.mrb[14].mxu0 %v88_v34  ;;  %2596 = vmatprep.subr.bf16.mxu1 %v2595_v26 }
  0x51   :  { %2574 = vmatpush3.bf16.msra.mxu0 %v2573_v35  ;;  %474 = vmatprep.mubr.f32.mxu0 %v121_v39 }
  0x52   :  { %2576 = vmatprep.subr.bf16.mxu0 %v2575_v36  ;;  %2598 = vmatpush3.bf16.msra.mxu1 %v2595_v26  ;;  %v2607_v26 = vpack.c.bf16 %v732_v25, %v731_v24 }
  0x53   :  { %2600 = vmatprep.subr.bf16.mxu1 %v3330_v29 }
  0x55   :  { %2578 = vmatpush3.bf16.msra.mxu0 %v2577_v42 }
  0x56   :  { %2580 = vmatprep.subr.bf16.mxu0 %v2579_v43 }
  0x59   :  { %2582 = vmatpush3.bf16.msra.mxu0 %v2581_v48 }
  0x5a   :  { %2584 = vmatprep.subr.bf16.mxu0 %v2583_v49 }
  0x5d   :  { %2586 = vmatpush3.bf16.msra.mxu0 %v2585_v54 }
  0x5e   :  { %2588 = vmatprep.subr.bf16.mxu0 %v2587_v55 }
  0x61   :  { %2590 = vmatpush3.bf16.msra.mxu0 %v2589_v62 }
  0x64   :  { %475 = vmatmul.mubr.f32.vlgmr.msra.gmra.mrb[16].mxu0 %v118_v4 }
  0x65   :  { %479 = vmatprep.mubr.f32.mxu0 %v125_v1 }
  0x68   :  { %480 = vmatmul.mubr.f32.gmra.mrb[18].mxu0 %v123_v11 }
  0x69   :  { %484 = vmatprep.mubr.f32.mxu0 %v131_v15 }
  0x6c   :  { %485 = vmatmul.mubr.f32.gmra.mrb[20].mxu0 %v128_v16 }
  0x6d   :  { %489 = vmatprep.mubr.f32.mxu0 %v135_v18  ;;  %v524_v18 = vld [vmem:[%s3934_s2 + $0x18] sm:$0xff] }
  0x6e   :  { %v2603_v21 = vpack.c.bf16 %v524_v18, %v523_v17 }
  0x70   :  { %490 = vmatmul.mubr.f32.gmra.mrb[22].mxu0 %v133_v20 }
  0xf7   :  { %v2227_v30 = vpop.f32.mrb[0].mxu0 }
  0xf8   :  { %v2228_v31 = vpop.f32.mrb[1].mxu0 }
  0xf9   :  { %v2229_v32 = vadd.f32 %v2228_v31, %v2227_v30  ;;  %v733_v30 = vld [vmem:[%s3934_s2 + $0x50] sm:$0xff]  ;;  %v734_v31 = vld [vmem:[%s3934_s2 + $0x58] sm:$0xff] }
  0xfb   :  { %v2230_v33 = vpop.f32.mrb[2].mxu0 }
  0xfc   :  { %v2231_v61 = vpop.f32.mrb[3].mxu0 }
  0xfd   :  { %v2232_v34 = vadd.f32 %v2231_v61, %v2230_v33 }
  0xff   :  { %v2233_v35 = vpop.f32.mrb[4].mxu0 }
 0x100   :  { %v2234_v36 = vpop.f32.mrb[5].mxu0 }
 0x101   :  { %v2235_v37 = vadd.f32 %v2234_v36, %v2233_v35 }
 0x103   :  { %v2236_v38 = vpop.f32.mrb[6].mxu0 }
 0x104   :  { %v2237_v39 = vpop.f32.mrb[7].mxu0 }
 0x105   :  { %v2238_v40 = vadd.f32 %v2237_v39, %v2236_v38  ;;  %v939_v39 = vld [vmem:[%s3937_s5 + $0x40] sm:$0xff] }
 0x117   :  { %v2271_v41 = vpop.f32.mrb[8].mxu0 }
 0x118   :  { %v2272_v42 = vpop.f32.mrb[9].mxu0 }
 0x119   :  { %v2273_v43 = vadd.f32 %v2272_v42, %v2271_v41  ;;  %v941_v42 = vld [vmem:[%s3937_s5 + $0x50] sm:$0xff] }
 0x11b   :  { %v392_v44 = vadd.f32 %v2273_v43, %v2229_v32  ;;  %v2274_v45 = vpop.f32.mrb[10].mxu0  ;;  %v942_v43 = vld [vmem:[%s3937_s5 + $0x58] sm:$0xff] }
 0x11c   :  { %v2275_v46 = vpop.f32.mrb[11].mxu0 }
 0x11d   :  { %v2276_v47 = vadd.f32 %v2275_v46, %v2274_v45  ;;  %v943_v45 = vld [vmem:[%s3937_s5 + $0x60] sm:$0xff]  ;;  %v944_v46 = vld [vmem:[%s3937_s5 + $0x68] sm:$0xff] }
 0x11f   :  { %v397_v48 = vadd.f32 %v2276_v47, %v2232_v34  ;;  %v2277_v49 = vpop.f32.mrb[12].mxu0  ;;  %v2623_v47 = vpack.c.bf16 %v944_v46, %v943_v45 }
 0x120   :  { %v2278_v50 = vpop.f32.mrb[13].mxu0 }
 0x121   :  { %v2279_v51 = vadd.f32 %v2278_v50, %v2277_v49  ;;  %v946_v49 = vld [vmem:[%s3937_s5 + $0x78] sm:$0xff] }
 0x123   :  { %v402_v52 = vadd.f32 %v2279_v51, %v2235_v37  ;;  %v2280_v53 = vpop.f32.mrb[14].mxu0  ;;  %v927_v51 = vld [vmem:[%s3937_s5] sm:$0xff] }
 0x124   :  { %v2281_v54 = vpop.f32.mrb[15].mxu0 }
 0x125   :  { %v2282_v55 = vadd.f32 %v2281_v54, %v2280_v53 }
 0x127   :  { %v407_v56 = vadd.f32 %v2282_v55, %v2238_v40  ;;  %v940_v40 = vld [vmem:[%s3937_s5 + $0x48] sm:$0xff] }
 0x128   :  { %v2615_v41 = vpack.c.bf16 %v940_v40, %v939_v39 }
 0x12a   :  { %2616 = vmatprep.subr.bf16.mxu0 %v2615_v41 }
 0x12b   :  { %2618 = vmatpush3.bf16.msra.mxu0 %v2615_v41 }
 0x137   :  { %v2315_v57 = vpop.f32.mrb[16].mxu0 }
 0x138   :  { %v2316_v58 = vpop.f32.mrb[17].mxu0 }
 0x139   :  { %v2317_v59 = vadd.f32 %v2316_v58, %v2315_v57 }
 0x13b   :  { %v477_v60 = vadd.f32 %v2317_v59, %v392_v44  ;;  %v2318_v62 = vpop.f32.mrb[18].mxu0  ;;  %v2619_v44 = vpack.c.bf16 %v942_v43, %v941_v42 }
 0x13c   :  { %v2319_v63 = vpop.f32.mrb[19].mxu0 }
 0x13d   :  { %vm495_vm3 = vcmp.gt.f32.partialorder %v477_v60, 0.0  ;;  %v499_v0 = vmul.f32 0.1, %v477_v60  ;;  %v2320_v2 = vadd.f32 %v2319_v63, %v2318_v62  ;;  %2620 = vmatprep.subr.bf16.mxu0 %v2619_v44 }
 0x13e   :  { %2622 = vmatpush3.bf16.msra.mxu0 %v2619_v44 }
 0x13f   :  { %v503_v3 = vsel %vm495_vm3, %v477_v60, %v499_v0  ;;  %v482_v4 = vadd.f32 %v2320_v2, %v397_v48  ;;  %v2321_v5 = vpop.f32.mrb[20].mxu0  ;;  %2624 = vmatprep.subr.bf16.mxu0 %v2623_v47  ;;  %v945_v48 = vld [vmem:[%s3937_s5 + $0x70] sm:$0xff] }
 0x140   :  { %513 = vst.msk [vmem:[#allocation2 + $0x1] sm:$0xff] %vm512_vm4, %v503_v3  ;;  %v2322_v6 = vpop.f32.mrb[21].mxu0  ;;  %v2627_v50 = vpack.c.bf16 %v946_v49, %v945_v48 }
 0x141   :  { %vm496_vm5 = vcmp.gt.f32.partialorder %v482_v4, 0.0  ;;  %v500_v1 = vmul.f32 0.1, %v482_v4  ;;  %v2323_v7 = vadd.f32 %v2322_v6, %v2321_v5 }
 0x142   :  { %2626 = vmatpush3.bf16.msra.mxu0 %v2623_v47 }
 0x143   :  { %v504_v8 = vsel %vm496_vm5, %v482_v4, %v500_v1  ;;  %v487_v9 = vadd.f32 %v2323_v7, %v402_v52  ;;  %v2324_v10 = vpop.f32.mrb[22].mxu0  ;;  %2628 = vmatprep.subr.bf16.mxu0 %v2627_v50  ;;  %v928_v52 = vld [vmem:[%s3937_s5 + $0x8] sm:$0xff] }
 0x144   :  { %514 = vst.msk [vmem:[#allocation2 + $0x9] sm:$0xff] %vm512_vm4, %v504_v8  ;;  %v2325_v11 = vpop.f32.mrb[23].mxu0  ;;  %v3402_v53 = vpack.c.bf16 %v928_v52, %v927_v51 }
 0x145   :  { %vm497_vm6 = vcmp.gt.f32.partialorder %v487_v9, 0.0  ;;  %v501_v12 = vmul.f32 0.1, %v487_v9  ;;  %v2326_v15 = vadd.f32 %v2325_v11, %v2324_v10 }
 0x146   :  { %2630 = vmatpush3.bf16.msra.mxu0 %v2627_v50 }
 0x147   :  { %v505_v13 = vsel %vm497_vm6, %v487_v9, %v501_v12  ;;  %v492_v14 = vadd.f32 %v2326_v15, %v407_v56  ;;  %v525_v16 = vld [vmem:[#allocation2 + $0x1] sm:$0xff]  ;;  %2632 = vmatprep.subr.bf16.mxu0 %v3402_v53 }
 0x148   :  { %515 = vst.msk [vmem:[#allocation2 + $0x19] sm:$0xff] %vm512_vm4, %v505_v13  ;;  %2395 = vmatprep.mubr.msk.f32.mxu1 %vm512_vm4, %v525_v16  ;;  %v517_v32 = vld [vmem:[#allocation2] sm:$0xff] }
 0x149   :  { %vm498_vm7 = vcmp.gt.f32.partialorder %v492_v14, 0.0  ;;  %v502_v20 = vmul.f32 0.1, %v492_v14 }
 0x14b   :  { %v506_v22 = vsel %vm498_vm7, %v492_v14, %v502_v20  ;;  %v526_v23 = vld [vmem:[#allocation2 + $0x9] sm:$0xff] }
 0x14c   :  { %516 = vst.msk [vmem:[#allocation2 + $0x21] sm:$0xff] %vm512_vm4, %v506_v22  ;;  %2396 = vmatmul.mubr.msk.f32.vlgmr.msra.gmra.mrb[0].mxu1 %vm512_vm4, %v526_v23  ;;  %v518_v33 = vld [vmem:[#allocation2 + $0x8] sm:$0xff] }
 0x14d   :  { %2602 = vmatpush3.bf16.msra.mxu1 %v3330_v29  ;;  %v2611_v29 = vpack.c.bf16 %v734_v31, %v733_v30  ;;  %v727_v35 = vld [vmem:[#allocation2 + $0x2] sm:$0xff]  ;;  %v728_v36 = vld [vmem:[#allocation2 + $0xa] sm:$0xff] }
 0x14e   :  { %2604 = vmatprep.subr.bf16.mxu1 %v2603_v21 }
 0x14f   :  { %v527_v27 = vld [vmem:[#allocation2 + $0x19] sm:$0xff] }
 0x150   :  { %2398 = vmatprep.mubr.msk.f32.mxu1 %vm512_vm4, %v527_v27  ;;  %v519_v61 = vld [vmem:[#allocation2 + $0x18] sm:$0xff] }
 0x151   :  { %2606 = vmatpush3.bf16.msra.mxu1 %v2603_v21 }
 0x152   :  { %2608 = vmatprep.subr.bf16.mxu1 %v2607_v26 }
 0x153   :  { %v528_v28 = vld [vmem:[#allocation2 + $0x21] sm:$0xff] }
 0x154   :  { %2399 = vmatmul.mubr.msk.f32.gmra.mrb[2].mxu1 %vm512_vm4, %v528_v28  ;;  %v520_v34 = vld [vmem:[#allocation2 + $0x20] sm:$0xff] }
 0x155   :  { %2409 = vmatprep.mubr.msk.f32.mxu1 %vm512_vm4, %v517_v32  ;;  %v729_v37 = vld [vmem:[#allocation2 + $0x1a] sm:$0xff]  ;;  %v730_v38 = vld [vmem:[#allocation2 + $0x22] sm:$0xff] }
 0x158   :  { %2410 = vmatmul.mubr.msk.f32.vlgmr.msra.gmra.mrb[0].mxu1 %vm512_vm4, %v518_v33 }
 0x159   :  { %2610 = vmatpush3.bf16.msra.mxu1 %v2607_v26  ;;  %2412 = vmatprep.mubr.msk.f32.mxu1 %vm512_vm4, %v519_v61  ;;  %v2172_v61 = vld [vmem:[%s3935_s3] ss:$0 sm:$0xff] }
 0x15a   :  { %2612 = vmatprep.subr.bf16.mxu1 %v2611_v29 }
 0x15c   :  { %2413 = vmatmul.mubr.msk.f32.gmra.mrb[2].mxu1 %vm512_vm4, %v520_v34 }
 0x15d   :  { %2614 = vmatpush3.bf16.msra.mxu1 %v2611_v29  ;;  %2423 = vmatprep.mubr.msk.f32.mxu1 %vm512_vm4, %v727_v35 }
 0x160   :  { %2424 = vmatmul.mubr.msk.f32.vlgmr.msra.gmra.mrb[0].mxu1 %vm512_vm4, %v728_v36 }
 0x161   :  { %2426 = vmatprep.mubr.msk.f32.mxu1 %vm512_vm4, %v729_v37 }
 0x164   :  { %2427 = vmatmul.mubr.msk.f32.gmra.mrb[2].mxu1 %vm512_vm4, %v730_v38  ;;  %v2173_v38 = vld [vmem:[%s3936_s4] ss:$0 sm:$0xff]  ;;  %vm1771_vm4 = vcmask 1040384  }
 0x233   :  { %v2425_v54 = vpop.f32.mrb[0].mxu1 }
 0x234   :  { %v838_v55 = vsel %vm836_vm9, %v2425_v54, 0.0  ;;  %v813_v56 = vpop.f32.mrb[1].mxu1 }
 0x235   :  { %v837_v57 = vsel %vm836_vm9, %v813_v56, 0.0 }
 0x236   :  { %v839_v58 = vadd.f32 %v838_v55, %v837_v57  ;;  %v930_v57 = vld [vmem:[%s3937_s5 + $0x18] sm:$0xff] }
 0x237   :  { %v2428_v59 = vpop.f32.mrb[2].mxu1 }
 0x238   :  { %v823_v60 = vpop.f32.mrb[3].mxu1  ;;  %v842_v0 = vsel %vm836_vm9, %v2428_v59, 0.0 }
 0x239   :  { %v840_v62 = vsel %vm836_vm9, %v823_v60, 0.0 }
 0x23a   :  { %v841_v63 = vadd.f32 %v840_v62, %v839_v58  ;;  %v931_v62 = vld [vmem:[%s3937_s5 + $0x20] sm:$0xff] }
 0x23c   :  { %v843_v2 = vadd.f32 %v842_v0, %v841_v63  ;;  %v932_v63 = vld [vmem:[%s3937_s5 + $0x28] sm:$0xff] }
 0x23e   :  { %v844_v3 = vrot.slane %v843_v2, 4 }
 0x240   :  { %v845_v4 = vadd.f32 %v844_v3, %v843_v2  ;;  %v2639_v2 = vpack.c.bf16 %v932_v63, %v931_v62  ;;  %v1367_v63 = vld [vmem:[%s3940_s8 + $0xc8] sm:$0xff] }
 0x242   :  { %v846_v5 = vrot.slane %v845_v4, 2 }
 0x244   :  { %v847_v6 = vadd.f32 %v846_v5, %v845_v4  ;;  %v933_v4 = vld [vmem:[%s3937_s5 + $0x30] sm:$0xff]  ;;  %v934_v5 = vld [vmem:[%s3937_s5 + $0x38] sm:$0xff] }
 0x246   :  { %v848_v1 = vrot.slane %v847_v6, 1 }
 0x248   :  { %v849_v7 = vadd.f32 %v848_v1, %v847_v6  ;;  %v1145_v1 = vld [vmem:[%s3937_s5 + $0x80] sm:$0xff] }
 0x24a   :  { %v851_v8 = vmul.f32 0.03125, %v849_v7  ;;  %v1146_v7 = vld [vmem:[%s3937_s5 + $0x88] sm:$0xff] }
 0x24c   :  { %v852_v9 = vsub.f32 %v813_v56, %v851_v8  ;;  %v853_v10 = vsub.f32 %v2425_v54, %v851_v8  ;;  %v854_v11 = vsub.f32 %v823_v60, %v851_v8  ;;  %v855_v12 = vsub.f32 %v2428_v59, %v851_v8  ;;  %v929_v56 = vld [vmem:[%s3937_s5 + $0x10] sm:$0xff] }
 0x24d   :  { %v2635_v60 = vpack.c.bf16 %v930_v57, %v929_v56  ;;  %v2647_v8 = vpack.c.bf16 %v1146_v7, %v1145_v1  ;;  %v1363_v56 = vld [vmem:[%s3940_s8 + $0xa8] sm:$0xff]  ;;  %v1365_v57 = vld [vmem:[%s3940_s8 + $0xb8] sm:$0xff]  ;;  %v1370_v7 = vld [vmem:[%s3940_s8 + $0xe0] sm:$0xff] }
 0x24e   :  { %v856_v15 = vmul.f32 %v852_v9, %v852_v9  ;;  %v857_v13 = vmul.f32 %v853_v10, %v853_v10  ;;  %v858_v14 = vmul.f32 %v854_v11, %v854_v11  ;;  %v859_v16 = vmul.f32 %v855_v12, %v855_v12 }
 0x250   :  { %v860_v17 = vsel %vm836_vm9, %v856_v15, 0.0  ;;  %v861_v18 = vsel %vm836_vm9, %v857_v13, 0.0  ;;  %v863_v21 = vsel %vm836_vm9, %v858_v14, 0.0  ;;  %v865_v23 = vsel %vm836_vm9, %v859_v16, 0.0  ;;  %v1149_v15 = vld [vmem:[%s3937_s5 + $0xa0] sm:$0xff]  ;;  %v1150_v13 = vld [vmem:[%s3937_s5 + $0xa8] sm:$0xff] }
 0x251   :  { %v862_v20 = vadd.f32 %v861_v18, %v860_v17  ;;  %v2655_v16 = vpack.c.bf16 %v1150_v13, %v1149_v15  ;;  %v1151_v18 = vld [vmem:[%s3937_s5 + $0xb0] sm:$0xff]  ;;  %v1374_v15 = vld [vmem:[%s3940_s8 + $0x100] sm:$0xff] }
 0x252   :  { %v1376_v13 = vld [vmem:[%s3940_s8 + $0x110] sm:$0xff] }
 0x253   :  { %v864_v22 = vadd.f32 %v863_v21, %v862_v20  ;;  %v1152_v20 = vld [vmem:[%s3937_s5 + $0xb8] sm:$0xff] }
 0x255   :  { %v866_v24 = vadd.f32 %v865_v23, %v864_v22  ;;  %v2659_v22 = vpack.c.bf16 %v1152_v20, %v1151_v18  ;;  %v1378_v20 = vld [vmem:[%s3940_s8 + $0x120] sm:$0xff] }
 0x257   :  { %v867_v25 = vrot.slane %v866_v24, 4 }
 0x259   :  { %v868_v26 = vadd.f32 %v867_v25, %v866_v24 }
 0x25b   :  { %v869_v27 = vrot.slane %v868_v26, 2 }
 0x25d   :  { %v870_v28 = vadd.f32 %v869_v27, %v868_v26  ;;  %v1343_v26 = vld [vmem:[%s3940_s8 + $0x8] sm:$0xff]  ;;  %v1345_v27 = vld [vmem:[%s3940_s8 + $0x18] sm:$0xff] }
 0x25f   :  { %v871_v30 = vrot.slane %v870_v28, 1 }
 0x261   :  { %v872_v31 = vadd.f32 %v871_v30, %v870_v28  ;;  %v2663_v28 = vpack.c.bf16 %v1345_v27, %v1343_v26  ;;  %v1342_v30 = vld [vmem:[%s3940_s8] sm:$0xff]  ;;  %v1384_v27 = vld [vmem:[%s3940_s8 + $0x150] sm:$0xff] }
 0x262   :  { %v1382_v26 = vld [vmem:[%s3940_s8 + $0x140] sm:$0xff] }
 0x263   :  { %v873_v32 = vmul.f32 0.03125, %v872_v31  ;;  %v1344_v31 = vld [vmem:[%s3940_s8 + $0x10] sm:$0xff]  ;;  %2664 = vmatprep.subr.bf16.mxu1 %v2663_v28  ;;  %v2705_v28 = vpack.c.bf16 %v1384_v27, %v1382_v26 }
 0x265   :  { %v874_v29 = vadd.f32 1e-05, %v873_v32  ;;  %v2665_v32 = vpack.c.bf16 %v1344_v31, %v1342_v30  ;;  %v1387_v30 = vld [vmem:[%s3940_s8 + $0x168] sm:$0xff]  ;;  %v1389_v31 = vld [vmem:[%s3940_s8 + $0x178] sm:$0xff] }
 0x267   :  { %2788 = vrsqrt.f32 %v874_v29  ;;  %2666 = vmatpush1.bf16.msra.mxu1 %v2665_v32  ;;  %v1347_v29 = vld [vmem:[%s3940_s8 + $0x28] sm:$0xff]  ;;  %v2707_v32 = vpack.c.bf16 %v1389_v31, %v1387_v30 }
 0x271   :  { %v2789_v33 = vpop.eup %2788 }
 0x272   :  { %v876_v34 = vmul.f32 %v2789_v33, %v852_v9  ;;  %v877_v35 = vmul.f32 %v2789_v33, %v853_v10  ;;  %v878_v36 = vmul.f32 %v2789_v33, %v854_v11  ;;  %v879_v37 = vmul.f32 %v2789_v33, %v855_v12  ;;  %v1147_v9 = vld [vmem:[%s3937_s5 + $0x90] sm:$0xff]  ;;  %v1148_v10 = vld [vmem:[%s3937_s5 + $0x98] sm:$0xff] }
 0x273   :  { %v2651_v11 = vpack.c.bf16 %v1148_v10, %v1147_v9  ;;  %v1349_v33 = vld [vmem:[%s3940_s8 + $0x38] sm:$0xff]  ;;  %v1375_v10 = vld [vmem:[%s3940_s8 + $0x108] sm:$0xff] }
 0x274   :  { %v887_v39 = vmul.f32 %v2172_v61, %v876_v34  ;;  %v888_v40 = vmul.f32 %v2172_v61, %v877_v35  ;;  %v889_v41 = vmul.f32 %v2172_v61, %v878_v36  ;;  %v890_v42 = vmul.f32 %v2172_v61, %v879_v37  ;;  %v1346_v34 = vld [vmem:[%s3940_s8 + $0x20] sm:$0xff]  ;;  %v1348_v35 = vld [vmem:[%s3940_s8 + $0x30] sm:$0xff]  ;;  %v1351_v37 = vld [vmem:[%s3940_s8 + $0x48] sm:$0xff] }
 0x275   :  { %v2667_v61 = vpack.c.bf16 %v1349_v33, %v1347_v29  ;;  %v2669_v36 = vpack.c.bf16 %v1348_v35, %v1346_v34  ;;  %v1386_v29 = vld [vmem:[%s3940_s8 + $0x160] sm:$0xff]  ;;  %v1388_v33 = vld [vmem:[%s3940_s8 + $0x170] sm:$0xff]  ;;  %v1391_v34 = vld [vmem:[%s3940_s8 + $0x188] sm:$0xff] }
 0x276   :  { %v898_v43 = vadd.f32 %v2173_v38, %v887_v39  ;;  %v899_v44 = vadd.f32 %v2173_v38, %v888_v40  ;;  %v900_v45 = vadd.f32 %v2173_v38, %v889_v41  ;;  %v901_v46 = vadd.f32 %v2173_v38, %v890_v42  ;;  %v1353_v38 = vld [vmem:[%s3940_s8 + $0x58] sm:$0xff]  ;;  %v1350_v40 = vld [vmem:[%s3940_s8 + $0x40] sm:$0xff]  ;;  %v1352_v41 = vld [vmem:[%s3940_s8 + $0x50] sm:$0xff] }
 0x277   :  { %2668 = vmatprep.subr.bf16.mxu1 %v2667_v61  ;;  %v2671_v39 = vpack.c.bf16 %v1353_v38, %v1351_v37  ;;  %v2673_v42 = vpack.c.bf16 %v1352_v41, %v1350_v40  ;;  %v2709_v61 = vpack.c.bf16 %v1388_v33, %v1386_v29  ;;  %v1393_v35 = vld [vmem:[%s3940_s8 + $0x198] sm:$0xff]  ;;  %v1390_v37 = vld [vmem:[%s3940_s8 + $0x180] sm:$0xff]  ;;  %v1392_v38 = vld [vmem:[%s3940_s8 + $0x190] sm:$0xff] }
 0x278   :  { %vm902_vm10 = vcmp.gt.f32.partialorder %v898_v43, 0.0  ;;  %vm903_vm11 = vcmp.gt.f32.partialorder %v899_v44, 0.0  ;;  %vm904_vm12 = vcmp.gt.f32.partialorder %v900_v45, 0.0  ;;  %vm905_vm13 = vcmp.gt.f32.partialorder %v901_v46, 0.0  ;;  %2670 = vmatpush1.bf16.msra.mxu1 %v2669_v36  ;;  %v1395_v40 = vld [vmem:[%s3940_s8 + $0x1a8] sm:$0xff]  ;;  %v1397_v41 = vld [vmem:[%s3940_s8 + $0x1b8] sm:$0xff] }
 0x279   :  { %v906_v47 = vmul.f32 0.1, %v898_v43  ;;  %v907_v48 = vmul.f32 0.1, %v899_v44  ;;  %v908_v49 = vmul.f32 0.1, %v900_v45  ;;  %2672 = vmatprep.subr.bf16.mxu1 %v2671_v39  ;;  %v2711_v36 = vpack.c.bf16 %v1393_v35, %v1391_v34 }
 0x27a   :  { %v909_v50 = vmul.f32 0.1, %v901_v46  ;;  %v2713_v39 = vpack.c.bf16 %v1392_v38, %v1390_v37  ;;  %v2186_v33 = vld [vmem:[%s3938_s6] ss:$0 sm:$0xff] }
 0x27b   :  { %v910_v51 = vsel %vm902_vm10, %v898_v43, %v906_v47  ;;  %v911_v52 = vsel %vm903_vm11, %v899_v44, %v907_v48  ;;  %v912_v54 = vsel %vm904_vm12, %v900_v45, %v908_v49  ;;  %v1355_v43 = vld [vmem:[%s3940_s8 + $0x68] sm:$0xff]  ;;  %v1357_v44 = vld [vmem:[%s3940_s8 + $0x78] sm:$0xff]  ;;  %v1356_v47 = vld [vmem:[%s3940_s8 + $0x70] sm:$0xff] }
 0x27c   :  { %v913_v55 = vsel %vm905_vm13, %v901_v46, %v909_v50  ;;  %919 = vst.msk [vmem:[#allocation3 + $0x1] sm:$0xff] %vm836_vm9, %v910_v51  ;;  %920 = vst.msk [vmem:[#allocation3 + $0x9] sm:$0xff] %vm836_vm9, %v911_v52  ;;  %2674 = vmatpush1.bf16.msra.mxu1 %v2673_v42  ;;  %v2675_v45 = vpack.c.bf16 %v1357_v44, %v1355_v43  ;;  %v1354_v46 = vld [vmem:[%s3940_s8 + $0x60] sm:$0xff]  ;;  %v1359_v49 = vld [vmem:[%s3940_s8 + $0x88] sm:$0xff]  ;;  %v2715_v42 = vpack.c.bf16 %v1397_v41, %v1395_v40  ;;  %vm1890_vm13 = vcmask 1047554  }
 0x27d   :  { %921 = vst.msk [vmem:[#allocation3 + $0x19] sm:$0xff] %vm836_vm9, %v912_v54  ;;  %922 = vst.msk [vmem:[#allocation3 + $0x21] sm:$0xff] %vm836_vm9, %v913_v55  ;;  %v2677_v48 = vpack.c.bf16 %v1356_v47, %v1354_v46  ;;  %v1361_v50 = vld [vmem:[%s3940_s8 + $0x98] sm:$0xff]  ;;  %v1358_v52 = vld [vmem:[%s3940_s8 + $0x80] sm:$0xff] }
 0x27e   :  { %2676 = vmatprep.subr.bf16.mxu1 %v2675_v45  ;;  %v2679_v51 = vpack.c.bf16 %v1361_v50, %v1359_v49  ;;  %v1360_v54 = vld [vmem:[%s3940_s8 + $0x90] sm:$0xff]  ;;  %v1394_v43 = vld [vmem:[%s3940_s8 + $0x1a0] sm:$0xff]  ;;  %v1399_v46 = vld [vmem:[%s3940_s8 + $0x1c8] sm:$0xff] }
 0x27f   :  { %v2681_v55 = vpack.c.bf16 %v1360_v54, %v1358_v52  ;;  %v1396_v44 = vld [vmem:[%s3940_s8 + $0x1b0] sm:$0xff]  ;;  %v1401_v47 = vld [vmem:[%s3940_s8 + $0x1d8] sm:$0xff]  ;;  %v1398_v49 = vld [vmem:[%s3940_s8 + $0x1c0] sm:$0xff] }
 0x280   :  { %2678 = vmatpush1.bf16.msra.mxu1 %v2677_v48  ;;  %v2717_v45 = vpack.c.bf16 %v1396_v44, %v1394_v43  ;;  %v2719_v48 = vpack.c.bf16 %v1401_v47, %v1399_v46  ;;  %v1400_v50 = vld [vmem:[%s3940_s8 + $0x1d0] sm:$0xff]  ;;  %v1403_v52 = vld [vmem:[%s3940_s8 + $0x1e8] sm:$0xff]  ;;  %v1405_v54 = vld [vmem:[%s3940_s8 + $0x1f8] sm:$0xff] }
 0x281   :  { %2680 = vmatprep.subr.bf16.mxu1 %v2679_v51  ;;  %v2721_v51 = vpack.c.bf16 %v1400_v50, %v1398_v49  ;;  %v2187_v37 = vld [vmem:[%s3939_s7] ss:$0 sm:$0xff] }
 0x283   :  { %v935_v58 = vld [vmem:[#allocation3 + $0x1] sm:$0xff]  ;;  %v936_v59 = vld [vmem:[#allocation3 + $0x9] sm:$0xff] }
 0x284   :  { %2445 = vmatprep.mubr.msk.f32.mxu0 %vm836_vm9, %v935_v58  ;;  %v937_v0 = vld [vmem:[#allocation3 + $0x19] sm:$0xff]  ;;  %v938_v3 = vld [vmem:[#allocation3 + $0x21] sm:$0xff]  ;;  %v1142_v23 = vld [vmem:[#allocation3 + $0xa] sm:$0xff]  ;;  %2682 = vmatpush1.bf16.msra.mxu1 %v2681_v55  ;;  %v2683_v58 = vpack.c.bf16 %v1365_v57, %v1363_v56  ;;  %v2723_v56 = vpack.c.bf16 %v1405_v54, %v1403_v52 }
 0x285   :  { %2446 = vmatmul.mubr.msk.f32.vlgmr.msra.gmra.mrb[24].mxu0 %vm836_vm9, %v936_v59  ;;  %v923_v6 = vld [vmem:[#allocation3] sm:$0xff]  ;;  %v924_v12 = vld [vmem:[#allocation3 + $0x8] sm:$0xff]  ;;  %v925_v14 = vld [vmem:[#allocation3 + $0x18] sm:$0xff] }
 0x286   :  { %2634 = vmatpush3.bf16.msra.mxu0 %v3402_v53  ;;  %2448 = vmatprep.mubr.msk.f32.mxu0 %vm836_vm9, %v937_v0  ;;  %v2643_v53 = vpack.c.bf16 %v934_v5, %v933_v4  ;;  %v926_v17 = vld [vmem:[#allocation3 + $0x20] sm:$0xff]  ;;  %v1362_v59 = vld [vmem:[%s3940_s8 + $0xa0] sm:$0xff]  ;;  %v1369_v0 = vld [vmem:[%s3940_s8 + $0xd8] sm:$0xff] }
 0x287   :  { %2636 = vmatprep.subr.bf16.mxu0 %v2635_v60  ;;  %v1141_v21 = vld [vmem:[#allocation3 + $0x2] sm:$0xff]  ;;  %v1143_v24 = vld [vmem:[#allocation3 + $0x1a] sm:$0xff]  ;;  %2684 = vmatprep.subr.bf16.mxu1 %v2683_v58  ;;  %v1402_v55 = vld [vmem:[%s3940_s8 + $0x1e0] sm:$0xff] }
 0x288   :  { %v1144_v25 = vld [vmem:[#allocation3 + $0x22] sm:$0xff]  ;;  %v1407_v58 = vld [vmem:[%s3940_s8 + $0x208] sm:$0xff] }
 0x289   :  { %2449 = vmatmul.mubr.msk.f32.gmra.mrb[26].mxu0 %vm836_vm9, %v938_v3  ;;  %v1366_v3 = vld [vmem:[%s3940_s8 + $0xc0] sm:$0xff]  ;;  %v1368_v4 = vld [vmem:[%s3940_s8 + $0xd0] sm:$0xff] }
 0x28a   :  { %2638 = vmatpush3.bf16.msra.mxu0 %v2635_v60  ;;  %2467 = vmatprep.mubr.msk.f32.mxu0 %vm836_vm9, %v923_v6  ;;  %v1364_v60 = vld [vmem:[%s3940_s8 + $0xb0] sm:$0xff]  ;;  %v2689_v5 = vpack.c.bf16 %v1368_v4, %v1366_v3  ;;  %v1371_v6 = vld [vmem:[%s3940_s8 + $0xe8] sm:$0xff] }
 0x28b   :  { %2640 = vmatprep.subr.bf16.mxu0 %v2639_v2  ;;  %v2685_v62 = vpack.c.bf16 %v1364_v60, %v1362_v59  ;;  %v1404_v57 = vld [vmem:[%s3940_s8 + $0x1f0] sm:$0xff]  ;;  %v1409_v59 = vld [vmem:[%s3940_s8 + $0x218] sm:$0xff] }
 0x28c   :  { %v2725_v60 = vpack.c.bf16 %v1404_v57, %v1402_v55  ;;  %v1406_v55 = vld [vmem:[%s3940_s8 + $0x200] sm:$0xff]  ;;  %v1411_v57 = vld [vmem:[%s3940_s8 + $0x228] sm:$0xff] }
 0x28d   :  { %2686 = vmatpush1.bf16.msra.mxu1 %v2685_v62  ;;  %v2727_v62 = vpack.c.bf16 %v1409_v59, %v1407_v58  ;;  %v1413_v58 = vld [vmem:[%s3940_s8 + $0x238] sm:$0xff] }
 0x28e   :  { %2642 = vmatpush3.bf16.msra.mxu0 %v2639_v2  ;;  %v2687_v2 = vpack.c.bf16 %v1369_v0, %v1367_v63 }
 0x28f   :  { %2644 = vmatprep.subr.bf16.mxu0 %v2643_v53 }
 0x290   :  { %2688 = vmatprep.subr.bf16.mxu1 %v2687_v2 }
 0x291   :  { %2690 = vmatpush1.bf16.msra.mxu1 %v2689_v5 }
 0x292   :  { %2646 = vmatpush3.bf16.msra.mxu0 %v2643_v53  ;;  %v1373_v53 = vld [vmem:[%s3940_s8 + $0xf8] sm:$0xff] }
 0x293   :  { %2648 = vmatprep.subr.bf16.mxu0 %v2647_v8  ;;  %v2691_v1 = vpack.c.bf16 %v1373_v53, %v1371_v6 }
 0x295   :  { %2468 = vmatmul.mubr.msk.f32.vlgmr.msra.gmra.mrb[24].mxu0 %vm836_vm9, %v924_v12  ;;  %2692 = vmatprep.subr.bf16.mxu1 %v2691_v1 }
 0x296   :  { %2470 = vmatprep.mubr.msk.f32.mxu0 %vm836_vm9, %v925_v14  ;;  %2650 = vmatpush3.bf16.msra.mxu0 %v2647_v8  ;;  %v1372_v8 = vld [vmem:[%s3940_s8 + $0xf0] sm:$0xff]  ;;  %v2697_v14 = vpack.c.bf16 %v1376_v13, %v1374_v15 }
 0x297   :  { %2652 = vmatprep.subr.bf16.mxu0 %v2651_v11  ;;  %v2693_v9 = vpack.c.bf16 %v1372_v8, %v1370_v7 }
 0x299   :  { %2471 = vmatmul.mubr.msk.f32.gmra.mrb[26].mxu0 %vm836_vm9, %v926_v17  ;;  %2694 = vmatpush1.bf16.msra.mxu1 %v2693_v9  ;;  %v1381_v17 = vld [vmem:[%s3940_s8 + $0x138] sm:$0xff] }
 0x29a   :  { %2654 = vmatpush3.bf16.msra.mxu0 %v2651_v11  ;;  %2489 = vmatprep.mubr.msk.f32.mxu0 %vm836_vm9, %v1141_v21  ;;  %v1377_v11 = vld [vmem:[%s3940_s8 + $0x118] sm:$0xff]  ;;  %v1380_v21 = vld [vmem:[%s3940_s8 + $0x130] sm:$0xff] }
 0x29b   :  { %2656 = vmatprep.subr.bf16.mxu0 %v2655_v16  ;;  %v2695_v12 = vpack.c.bf16 %v1377_v11, %v1375_v10 }
 0x29d   :  { %2696 = vmatprep.subr.bf16.mxu1 %v2695_v12 }
 0x29e   :  { %2658 = vmatpush3.bf16.msra.mxu0 %v2655_v16  ;;  %2698 = vmatpush1.bf16.msra.mxu1 %v2697_v14  ;;  %v1379_v16 = vld [vmem:[%s3940_s8 + $0x128] sm:$0xff] }
 0x29f   :  { %2660 = vmatprep.subr.bf16.mxu0 %v2659_v22  ;;  %v2699_v18 = vpack.c.bf16 %v1381_v17, %v1379_v16 }
 0x2a1   :  { %2700 = vmatprep.subr.bf16.mxu1 %v2699_v18 }
 0x2a2   :  { %2662 = vmatpush3.bf16.msra.mxu0 %v2659_v22  ;;  %v2701_v22 = vpack.c.bf16 %v1380_v21, %v1378_v20 }
 0x2a4   :  { %2702 = vmatpush1.bf16.msra.mxu1 %v2701_v22 }
 0x2a5   :  { %2490 = vmatmul.mubr.msk.f32.vlgmr.msra.gmra.mrb[24].mxu0 %vm836_vm9, %v1142_v23  ;;  %v1383_v23 = vld [vmem:[%s3940_s8 + $0x148] sm:$0xff] }
 0x2a6   :  { %2492 = vmatprep.mubr.msk.f32.mxu0 %vm836_vm9, %v1143_v24  ;;  %v1385_v24 = vld [vmem:[%s3940_s8 + $0x158] sm:$0xff] }
 0x2a9   :  { %2493 = vmatmul.mubr.msk.f32.gmra.mrb[26].mxu0 %vm836_vm9, %v1144_v25  ;;  %v2703_v25 = vpack.c.bf16 %v1385_v24, %v1383_v23 }
 0x2ab   :  { %2704 = vmatprep.subr.bf16.mxu1 %v2703_v25 }
 0x2ac   :  { %2706 = vmatpush1.bf16.msra.mxu1 %v2705_v28 }
 0x2ad   :  { %2708 = vmatprep.subr.bf16.mxu1 %v2707_v32 }
 0x2b0   :  { %2710 = vmatpush1.bf16.msra.mxu1 %v2709_v61 }
 0x2b1   :  { %2712 = vmatprep.subr.bf16.mxu1 %v2711_v36 }
 0x2b4   :  { %2714 = vmatpush1.bf16.msra.mxu1 %v2713_v39 }
 0x2b5   :  { %2716 = vmatprep.subr.bf16.mxu1 %v2715_v42 }
 0x2b8   :  { %2718 = vmatpush1.bf16.msra.mxu1 %v2717_v45 }
 0x2b9   :  { %2720 = vmatprep.subr.bf16.mxu1 %v2719_v48 }
 0x2bc   :  { %2722 = vmatpush1.bf16.msra.mxu1 %v2721_v51 }
 0x2bd   :  { %2724 = vmatprep.subr.bf16.mxu1 %v2723_v56  ;;  %v1408_v56 = vld [vmem:[%s3940_s8 + $0x210] sm:$0xff] }
 0x2be   :  { %v2729_v59 = vpack.c.bf16 %v1408_v56, %v1406_v55 }
 0x2c0   :  { %2726 = vmatpush1.bf16.msra.mxu1 %v2725_v60  ;;  %v2731_v60 = vpack.c.bf16 %v1413_v58, %v1411_v57 }
 0x2c1   :  { %2728 = vmatprep.subr.bf16.mxu1 %v2727_v62  ;;  %v1410_v62 = vld [vmem:[%s3940_s8 + $0x220] sm:$0xff] }
 0x378   :  { %v2491_v63 = vpop.f32.mrb[24].mxu0 }
 0x379   :  { %v1231_v0 = vpop.f32.mrb[25].mxu0 }
 0x37a   :  { %v1254_v2 = vadd.f32 %v2491_v63, %v1231_v0 }
 0x37c   :  { %v2494_v3 = vpop.f32.mrb[26].mxu0 }
 0x37d   :  { %v1241_v4 = vpop.f32.mrb[27].mxu0 }
 0x37e   :  { %v1255_v5 = vadd.f32 %v1254_v2, %v1241_v4  ;;  %v1415_v2 = vld [vmem:[%s3940_s8 + $0x248] sm:$0xff] }
 0x380   :  { %v1256_v6 = vadd.f32 %v2494_v3, %v1255_v5 }
 0x382   :  { %v1257_v53 = vrot.slane %v1256_v6, 4 }
 0x384   :  { %v1258_v1 = vadd.f32 %v1257_v53, %v1256_v6  ;;  %v1414_v6 = vld [vmem:[%s3940_s8 + $0x240] sm:$0xff]  ;;  %v1416_v53 = vld [vmem:[%s3940_s8 + $0x250] sm:$0xff] }
 0x386   :  { %v1259_v7 = vrot.slane %v1258_v1, 2 }
 0x388   :  { %v1260_v8 = vadd.f32 %v1259_v7, %v1258_v1  ;;  %v1419_v7 = vld [vmem:[%s3940_s8 + $0x268] sm:$0xff] }
 0x38a   :  { %v1261_v9 = vrot.slane %v1260_v8, 1 }
 0x38c   :  { %v1262_v10 = vadd.f32 %v1261_v9, %v1260_v8  ;;  %v1421_v8 = vld [vmem:[%s3940_s8 + $0x278] sm:$0xff]  ;;  %v2737_v9 = vpack.c.bf16 %v1416_v53, %v1414_v6 }
 0x38e   :  { %v1263_v11 = vmul.f32 0.03125, %v1262_v10  ;;  %v2739_v10 = vpack.c.bf16 %v1421_v8, %v1419_v7 }
 0x390   :  { %v1264_v12 = vsub.f32 %v1231_v0, %v1263_v11  ;;  %v1265_v15 = vsub.f32 %v2491_v63, %v1263_v11  ;;  %v1266_v13 = vsub.f32 %v1241_v4, %v1263_v11  ;;  %v1267_v14 = vsub.f32 %v2494_v3, %v1263_v11  ;;  %v1412_v63 = vld [vmem:[%s3940_s8 + $0x230] sm:$0xff]  ;;  %v1417_v3 = vld [vmem:[%s3940_s8 + $0x258] sm:$0xff]  ;;  %v1418_v11 = vld [vmem:[%s3940_s8 + $0x260] sm:$0xff] }
 0x391   :  { %v2733_v4 = vpack.c.bf16 %v1412_v63, %v1410_v62  ;;  %v2735_v5 = vpack.c.bf16 %v1417_v3, %v1415_v2 }
 0x392   :  { %v1268_v16 = vmul.f32 %v1264_v12, %v1264_v12  ;;  %v1269_v17 = vmul.f32 %v1265_v15, %v1265_v15  ;;  %v1270_v18 = vmul.f32 %v1266_v13, %v1266_v13  ;;  %v1271_v21 = vmul.f32 %v1267_v14, %v1267_v14 }
 0x394   :  { %v1272_v20 = vadd.f32 %v1269_v17, %v1268_v16 }
 0x396   :  { %v1273_v22 = vadd.f32 %v1272_v20, %v1270_v18  ;;  %v1422_v18 = vld [vmem:[%s3940_s8 + $0x280] sm:$0xff]  ;;  %v1424_v20 = vld [vmem:[%s3940_s8 + $0x290] sm:$0xff] }
 0x398   :  { %v1274_v23 = vadd.f32 %v1273_v22, %v1271_v21  ;;  %v1427_v22 = vld [vmem:[%s3940_s8 + $0x2a8] sm:$0xff] }
 0x39a   :  { %v1275_v24 = vrot.slane %v1274_v23, 4 }
 0x39c   :  { %v1276_v25 = vadd.f32 %v1275_v24, %v1274_v23  ;;  %v1429_v23 = vld [vmem:[%s3940_s8 + $0x2b8] sm:$0xff]  ;;  %v2745_v24 = vpack.c.bf16 %v1424_v20, %v1422_v18 }
 0x39e   :  { %v1277_v26 = vrot.slane %v1276_v25, 2 }
 0x3a0   :  { %v1278_v27 = vadd.f32 %v1277_v26, %v1276_v25  ;;  %v2747_v25 = vpack.c.bf16 %v1429_v23, %v1427_v22  ;;  %v1426_v26 = vld [vmem:[%s3940_s8 + $0x2a0] sm:$0xff] }
 0x3a2   :  { %v1279_v28 = vrot.slane %v1278_v27, 1 }
 0x3a4   :  { %v1280_v30 = vadd.f32 %v1279_v28, %v1278_v27  ;;  %v1428_v27 = vld [vmem:[%s3940_s8 + $0x2b0] sm:$0xff]  ;;  %v1431_v28 = vld [vmem:[%s3940_s8 + $0x2c8] sm:$0xff] }
 0x3a6   :  { %v1281_v31 = vmul.f32 0.03125, %v1280_v30  ;;  %v1433_v30 = vld [vmem:[%s3940_s8 + $0x2d8] sm:$0xff] }
 0x3a8   :  { %v1282_v32 = vadd.f32 1e-05, %v1281_v31  ;;  %v2749_v31 = vpack.c.bf16 %v1428_v27, %v1426_v26 }
 0x3aa   :  { %2790 = vrsqrt.f32 %v1282_v32  ;;  %v2751_v32 = vpack.c.bf16 %v1433_v30, %v1431_v28 }
 0x3b4   :  { %v2791_v29 = vpop.eup %2790 }
 0x3b5   :  { %v1284_v61 = vmul.f32 %v2791_v29, %v1264_v12  ;;  %v1285_v34 = vmul.f32 %v2791_v29, %v1265_v15  ;;  %v1286_v35 = vmul.f32 %v2791_v29, %v1266_v13  ;;  %v1287_v36 = vmul.f32 %v2791_v29, %v1267_v14  ;;  %v1420_v12 = vld [vmem:[%s3940_s8 + $0x270] sm:$0xff]  ;;  %v1423_v13 = vld [vmem:[%s3940_s8 + $0x288] sm:$0xff]  ;;  %v1425_v14 = vld [vmem:[%s3940_s8 + $0x298] sm:$0xff] }
 0x3b6   :  { %v2741_v16 = vpack.c.bf16 %v1420_v12, %v1418_v11  ;;  %v2743_v17 = vpack.c.bf16 %v1425_v14, %v1423_v13  ;;  %v1430_v29 = vld [vmem:[%s3940_s8 + $0x2c0] sm:$0xff] }
 0x3b7   :  { %v1295_v38 = vmul.f32 %v2186_v33, %v1284_v61  ;;  %v1296_v39 = vmul.f32 %v2186_v33, %v1285_v34  ;;  %v1297_v40 = vmul.f32 %v2186_v33, %v1286_v35  ;;  %v1298_v41 = vmul.f32 %v2186_v33, %v1287_v36  ;;  %v1432_v33 = vld [vmem:[%s3940_s8 + $0x2d0] sm:$0xff]  ;;  %v1435_v61 = vld [vmem:[%s3940_s8 + $0x2e8] sm:$0xff]  ;;  %v1437_v34 = vld [vmem:[%s3940_s8 + $0x2f8] sm:$0xff] }
 0x3b8   :  { %v2753_v35 = vpack.c.bf16 %v1432_v33, %v1430_v29  ;;  %v2755_v36 = vpack.c.bf16 %v1437_v34, %v1435_v61 }
 0x3b9   :  { %v1306_v42 = vadd.f32 %v2187_v37, %v1295_v38  ;;  %v1307_v43 = vadd.f32 %v2187_v37, %v1296_v39  ;;  %v1308_v44 = vadd.f32 %v2187_v37, %v1297_v40  ;;  %v1309_v45 = vadd.f32 %v2187_v37, %v1298_v41  ;;  %v1434_v37 = vld [vmem:[%s3940_s8 + $0x2e0] sm:$0xff]  ;;  %v1436_v38 = vld [vmem:[%s3940_s8 + $0x2f0] sm:$0xff] }
 0x3ba   :  { %v2757_v39 = vpack.c.bf16 %v1436_v38, %v1434_v37 }
 0x3bb   :  { %vm1310_vm14 = vcmp.gt.f32.partialorder %v1306_v42, 0.0  ;;  %vm1311_vm15 = vcmp.gt.f32.partialorder %v1307_v43, 0.0  ;;  %vm1312_vm2 = vcmp.gt.f32.partialorder %v1308_v44, 0.0  ;;  %vm1313_vm3 = vcmp.gt.f32.partialorder %v1309_v45, 0.0 }
 0x3bc   :  { %v1314_v46 = vmul.f32 0.1, %v1306_v42  ;;  %v1315_v47 = vmul.f32 0.1, %v1307_v43  ;;  %v1316_v48 = vmul.f32 0.1, %v1308_v44 }
 0x3bd   :  { %v1317_v49 = vmul.f32 0.1, %v1309_v45 }
 0x3be   :  { %v1318_v50 = vsel %vm1310_vm14, %v1306_v42, %v1314_v46  ;;  %v1319_v51 = vsel %vm1311_vm15, %v1307_v43, %v1315_v47  ;;  %v1320_v52 = vsel %vm1312_vm2, %v1308_v44, %v1316_v48  ;;  %v1686_v44 = vlaneseq }
 0x3bf   :  { %v1321_v54 = vsel %vm1313_vm3, %v1309_v45, %v1317_v49  ;;  %1326 = vst [vmem:[#allocation4 + $0x1] sm:$0xff] %v1318_v50  ;;  %1327 = vst [vmem:[#allocation4 + $0x9] sm:$0xff] %v1319_v51  ;;  %1502 = vmatprep.mubr.f32.mxu1 %v1318_v50  ;;  %vm1958_vm14 = vcmask 1047555   ;;  %vm1836_vm15 = vcmask 1047553   ;;  %vm2026_vm2 = vcmask 1047556  }
 0x3c0   :  { %1328 = vst [vmem:[#allocation4 + $0x19] sm:$0xff] %v1320_v52  ;;  %1329 = vst [vmem:[#allocation4 + $0x21] sm:$0xff] %v1321_v54  ;;  %vm2059_vm3 = vcmask 1044480  }
 0x3c6   :  { %v1330_v0 = vld [vmem:[#allocation4] sm:$0xff]  ;;  %v1331_v1 = vld [vmem:[#allocation4 + $0x8] sm:$0xff] }
 0x3c7   :  { %1503 = vmatmul.mubr.f32.vlgmr.msra.gmra.mrb[4].mxu1 %v1330_v0  ;;  %v1332_v15 = vld [vmem:[#allocation4 + $0x18] sm:$0xff]  ;;  %v1333_v21 = vld [vmem:[#allocation4 + $0x20] sm:$0xff]  ;;  %v1339_v41 = vld [vmem:[#allocation4 + $0xa] sm:$0xff] }
 0x3c8   :  { %2730 = vmatpush1.bf16.msra.mxu1 %v2729_v59  ;;  %1508 = vmatprep.mubr.f32.mxu1 %v1319_v51  ;;  %v1338_v40 = vld [vmem:[#allocation4 + $0x2] sm:$0xff]  ;;  %v1340_v42 = vld [vmem:[#allocation4 + $0x1a] sm:$0xff] }
 0x3c9   :  { %2732 = vmatprep.subr.bf16.mxu1 %v2731_v60  ;;  %v1341_v43 = vld [vmem:[#allocation4 + $0x22] sm:$0xff] }
 0x3cb   :  { %1509 = vmatmul.mubr.f32.gmra.mrb[6].mxu1 %v1331_v1 }
 0x3cc   :  { %2734 = vmatpush1.bf16.msra.mxu1 %v2733_v4  ;;  %1514 = vmatprep.mubr.f32.mxu1 %v1320_v52 }
 0x3cd   :  { %2736 = vmatprep.subr.bf16.mxu1 %v2735_v5 }
 0x3cf   :  { %1515 = vmatmul.mubr.f32.gmra.mrb[8].mxu1 %v1332_v15 }
 0x3d0   :  { %2738 = vmatpush1.bf16.msra.mxu1 %v2737_v9  ;;  %1520 = vmatprep.mubr.f32.mxu1 %v1321_v54 }
 0x3d1   :  { %2740 = vmatprep.subr.bf16.mxu1 %v2739_v10 }
 0x3d3   :  { %1521 = vmatmul.mubr.f32.gmra.mrb[10].mxu1 %v1333_v21 }
 0x3d4   :  { %2742 = vmatpush1.bf16.msra.mxu1 %v2741_v16  ;;  %1591 = vmatprep.mubr.f32.mxu1 %v2836_v19 }
 0x3d5   :  { %2744 = vmatprep.subr.bf16.mxu1 %v2743_v17 }
 0x3d8   :  { %2746 = vmatpush1.bf16.msra.mxu1 %v2745_v24 }
 0x3d9   :  { %2748 = vmatprep.subr.bf16.mxu1 %v2747_v25 }
 0x3dc   :  { %2750 = vmatpush1.bf16.msra.mxu1 %v2749_v31 }
 0x3dd   :  { %2752 = vmatprep.subr.bf16.mxu1 %v2751_v32 }
 0x3e0   :  { %2754 = vmatpush1.bf16.msra.mxu1 %v2753_v35 }
 0x3e1   :  { %2756 = vmatprep.subr.bf16.mxu1 %v2755_v36 }
 0x3e4   :  { %2758 = vmatpush1.bf16.msra.mxu1 %v2757_v39 }
 0x3e7   :  { %1592 = vmatmul.mubr.f32.vlgmr.msra.gmra.mrb[4].mxu1 %v1338_v40 }
 0x3e8   :  { %1597 = vmatprep.mubr.f32.mxu1 %v2836_v19 }
 0x3eb   :  { %1598 = vmatmul.mubr.f32.gmra.mrb[6].mxu1 %v1339_v41 }
 0x3ec   :  { %1603 = vmatprep.mubr.f32.mxu1 %v2836_v19 }
 0x3ef   :  { %1604 = vmatmul.mubr.f32.gmra.mrb[8].mxu1 %v1340_v42 }
 0x3f0   :  { %1609 = vmatprep.mubr.f32.mxu1 %v2836_v19 }
 0x3f3   :  { %1610 = vmatmul.mubr.f32.gmra.mrb[10].mxu1 %v1341_v43 }
 0x4ba   :  { %v1593_v45 = vpop.f32.mrb[4].mxu1 }
 0x4bb   :  { %v1595_v46 = vpop.f32.mrb[5].mxu1 }
 0x4be   :  { %v1599_v47 = vpop.f32.mrb[6].mxu1 }
 0x4bf   :  { %v1616_v48 = vadd.f32 %v1599_v47, %v1593_v45  ;;  %v1601_v49 = vpop.f32.mrb[7].mxu1 }
 0x4c0   :  { %v1625_v50 = vadd.f32 %v1601_v49, %v1595_v46 }
 0x4c2   :  { %v1605_v51 = vpop.f32.mrb[8].mxu1 }
 0x4c3   :  { %v1617_v52 = vadd.f32 %v1616_v48, %v1605_v51  ;;  %v1607_v54 = vpop.f32.mrb[9].mxu1  ;;  %v3777_v48 = vshrl.u32 %v1686_v44, 7 }
 0x4c4   :  { %v1626_v55 = vadd.f32 %v1625_v50, %v1607_v54  ;;  %v1684_v50 = vld [vmem:[%s3941_s9] sm:$0x3] }
 0x4c6   :  { %v1611_v56 = vpop.f32.mrb[10].mxu1 }
 0x4c7   :  { %v1618_v57 = vadd.f32 %v1617_v52, %v1611_v56  ;;  %v1613_v58 = vpop.f32.mrb[11].mxu1  ;;  %v1704_v52 = vld [vmem:[%s3942_s10] sm:$0x3] }
 0x4c8   :  { %v1627_v59 = vadd.f32 %v1626_v55, %v1613_v58 }
 0x4c9   :  { %v1619_v60 = vrot.slane %v1618_v57, 4 }
 0x4ca   :  { %v1628_v62 = vrot.slane %v1627_v59, 4 }
 0x4cb   :  { %v1620_v19 = vadd.f32 %v1619_v60, %v1618_v57 }
 0x4cc   :  { %v1629_v63 = vadd.f32 %v1628_v62, %v1627_v59 }
 0x4cd   :  { %v1621_v0 = vrot.slane %v1620_v19, 2 }
 0x4ce   :  { %v1630_v2 = vrot.slane %v1629_v63, 2 }
 0x4cf   :  { %v1622_v3 = vadd.f32 %v1621_v0, %v1620_v19 }
 0x4d0   :  { %v1631_v4 = vadd.f32 %v1630_v2, %v1629_v63 }
 0x4d1   :  { %v1623_v5 = vrot.slane %v1622_v3, 1 }
 0x4d2   :  { %v1632_v6 = vrot.slane %v1631_v4, 1 }
 0x4d3   :  { %v1624_v53 = vadd.f32 %v1623_v5, %v1622_v3 }
 0x4d4   :  { %v1633_v1 = vadd.f32 %v1632_v6, %v1631_v4 }
 0x4d5   :  { %v1634_v7 = vmul.f32 0.03125, %v1624_v53 }
 0x4d6   :  { %v1635_v8 = vmul.f32 0.03125, %v1633_v1 }
 0x4d7   :  { %v1636_v9 = vsub.f32 %v1593_v45, %v1634_v7  ;;  %v1638_v10 = vsub.f32 %v1599_v47, %v1634_v7  ;;  %v1640_v11 = vsub.f32 %v1605_v51, %v1634_v7  ;;  %v1642_v12 = vsub.f32 %v1611_v56, %v1634_v7  ;;  %v2189_v7 = vld [vmem:[%s3943_s11 + $0x2] ss:$4 sm:$0x3] }
 0x4d8   :  { %v1637_v15 = vsub.f32 %v1595_v46, %v1635_v8  ;;  %v1639_v13 = vsub.f32 %v1601_v49, %v1635_v8  ;;  %v1641_v14 = vsub.f32 %v1607_v54, %v1635_v8  ;;  %v1643_v16 = vsub.f32 %v1613_v58, %v1635_v8 }
 0x4d9   :  { %v1644_v17 = vmul.f32 %v1636_v9, %v1636_v9  ;;  %v1646_v18 = vmul.f32 %v1638_v10, %v1638_v10  ;;  %v1648_v22 = vmul.f32 %v1640_v11, %v1640_v11  ;;  %v1650_v26 = vmul.f32 %v1642_v12, %v1642_v12 }
 0x4da   :  { %v1645_v20 = vmul.f32 %v1637_v15, %v1637_v15  ;;  %v1647_v21 = vmul.f32 %v1639_v13, %v1639_v13  ;;  %v1649_v24 = vmul.f32 %v1641_v14, %v1641_v14  ;;  %v1651_v28 = vmul.f32 %v1643_v16, %v1643_v16 }
 0x4db   :  { %v1652_v23 = vadd.f32 %v1646_v18, %v1644_v17  ;;  %v3780_v49 = vsub.s32 0, %v3777_v48  ;;  %v3786_v51 = vsub.s32 1, %v3777_v48 }
 0x4dc   :  { %v1661_v25 = vadd.f32 %v1647_v21, %v1645_v20  ;;  %v2190_v21 = vld [vmem:[%s3943_s11 + $0x3] ss:$4 sm:$0x3] }
 0x4dd   :  { %v1653_v27 = vadd.f32 %v1652_v23, %v1648_v22  ;;  %v1689_v54 = vrot.slane %v1684_v50, %v3780_v49  ;;  %v1709_v56 = vrot.slane %v1704_v52, %v3780_v49  ;;  %v1693_v57 = vrot.slane %v1684_v50, %v3786_v51 }
 0x4de   :  { %v1662_v30 = vadd.f32 %v1661_v25, %v1649_v24  ;;  %v1713_v58 = vrot.slane %v1704_v52, %v3786_v51 }
 0x4df   :  { %v1654_v31 = vadd.f32 %v1653_v27, %v1650_v26  ;;  %v3805_v27 = vrot.slane %v2190_v21, %v3780_v49 }
 0x4e0   :  { %v1663_v32 = vadd.f32 %v1662_v30, %v1651_v28 }
 0x4e1   :  { %v1655_v29 = vrot.slane %v1654_v31, 4 }
 0x4e2   :  { %v1664_v33 = vrot.slane %v1663_v32, 4 }
 0x4e3   :  { %v1656_v61 = vadd.f32 %v1655_v29, %v1654_v31 }
 0x4e4   :  { %v1665_v34 = vadd.f32 %v1664_v33, %v1663_v32 }
 0x4e5   :  { %v1657_v35 = vrot.slane %v1656_v61, 2 }
 0x4e6   :  { %v1666_v36 = vrot.slane %v1665_v34, 2 }
 0x4e7   :  { %v1658_v37 = vadd.f32 %v1657_v35, %v1656_v61 }
 0x4e8   :  { %v1667_v38 = vadd.f32 %v1666_v36, %v1665_v34 }
 0x4e9   :  { %v1659_v39 = vrot.slane %v1658_v37, 1 }
 0x4ea   :  { %v1668_v40 = vrot.slane %v1667_v38, 1 }
 0x4eb   :  { %v1660_v41 = vadd.f32 %v1659_v39, %v1658_v37 }
 0x4ec   :  { %v1669_v42 = vadd.f32 %v1668_v40, %v1667_v38  ;;  %v3809_v40 = vrot.slane %v2189_v7, %v3786_v51 }
 0x4ed   :  { %v1670_v43 = vmul.f32 0.03125, %v1660_v41 }
 0x4ee   :  { %v1671_v45 = vmul.f32 0.03125, %v1669_v42 }
 0x4ef   :  { %v1672_v46 = vadd.f32 1e-05, %v1670_v43 }
 0x4f0   :  { %v1673_v47 = vadd.f32 1e-05, %v1671_v45  ;;  %v2188_v45 = vld [vmem:[%s3943_s11 + $0x1] ss:$4 sm:$0x3] }
 0x4f1   :  { %2792 = vrsqrt.f32 %v1672_v46  ;;  %v3818_v46 = vrot.slane %v2190_v21, %v3786_v51 }
 0x4f2   :  { %2794 = vrsqrt.f32 %v1673_v47 }
 0x4fb   :  { %v2793_v55 = vpop.eup %2792 }
 0x4fc   :  { %v2795_v59 = vpop.eup %2794  ;;  %v1676_v60 = vmul.f32 %v2793_v55, %v1636_v9  ;;  %v1678_v62 = vmul.f32 %v2793_v55, %v1638_v10  ;;  %v1680_v19 = vmul.f32 %v2793_v55, %v1640_v11  ;;  %v1682_v63 = vmul.f32 %v2793_v55, %v1642_v12 }
 0x4fd   :  { %v1677_v0 = vmul.f32 %v2795_v59, %v1637_v15  ;;  %v1679_v2 = vmul.f32 %v2795_v59, %v1639_v13  ;;  %v1681_v3 = vmul.f32 %v2795_v59, %v1641_v14  ;;  %v1683_v4 = vmul.f32 %v2795_v59, %v1643_v16 }
 0x4fe   :  { %v1696_v5 = vmul.f32 %v1689_v54, %v1676_v60  ;;  %v1698_v6 = vmul.f32 %v1689_v54, %v1678_v62  ;;  %v1700_v53 = vmul.f32 %v1689_v54, %v1680_v19  ;;  %v1702_v1 = vmul.f32 %v1689_v54, %v1682_v63 }
 0x4ff   :  { %v1697_v8 = vmul.f32 %v1693_v57, %v1677_v0  ;;  %v1699_v17 = vmul.f32 %v1693_v57, %v1679_v2  ;;  %v1701_v18 = vmul.f32 %v1693_v57, %v1681_v3  ;;  %v1703_v9 = vmul.f32 %v1693_v57, %v1683_v4 }
 0x500   :  { %v1716_v10 = vadd.f32 %v1709_v56, %v1696_v5  ;;  %v1718_v11 = vadd.f32 %v1709_v56, %v1698_v6  ;;  %v1720_v12 = vadd.f32 %v1709_v56, %v1700_v53  ;;  %v1722_v20 = vadd.f32 %v1709_v56, %v1702_v1 }
 0x501   :  { %v1717_v15 = vadd.f32 %v1713_v58, %v1697_v8  ;;  %v1719_v13 = vadd.f32 %v1713_v58, %v1699_v17  ;;  %v1721_v14 = vadd.f32 %v1713_v58, %v1701_v18  ;;  %v3799_v16 = vrot.slane %v2189_v7, %v3780_v49 }
 0x502   :  { %vm1724_vm5 = vcmp.gt.f32.partialorder %v1716_v10, 0.0  ;;  %vm1726_vm6 = vcmp.gt.f32.partialorder %v1718_v11, 0.0  ;;  %vm1728_vm7 = vcmp.gt.f32.partialorder %v1720_v12, 0.0  ;;  %vm1730_vm8 = vcmp.gt.f32.partialorder %v1722_v20, 0.0 }
 0x503   :  { %v1732_v22 = vmul.f32 0.1, %v1716_v10  ;;  %v1734_v23 = vmul.f32 0.1, %v1718_v11  ;;  %v1736_v24 = vmul.f32 0.1, %v1720_v12  ;;  %v1723_v25 = vadd.f32 %v1713_v58, %v1703_v9 }
 0x504   :  { %v1738_v26 = vmul.f32 0.1, %v1722_v20  ;;  %vm1725_vm9 = vcmp.gt.f32.partialorder %v1717_v15, 0.0  ;;  %vm1727_vm10 = vcmp.gt.f32.partialorder %v1719_v13, 0.0  ;;  %vm1729_vm11 = vcmp.gt.f32.partialorder %v1721_v14, 0.0 }
 0x505   :  { %v1740_v28 = vsel %vm1724_vm5, %v1716_v10, %v1732_v22  ;;  %v1742_v30 = vsel %vm1726_vm6, %v1718_v11, %v1734_v23  ;;  %v1744_v31 = vsel %vm1728_vm7, %v1720_v12, %v1736_v24  ;;  %vm1731_vm12 = vcmp.gt.f32.partialorder %v1723_v25, 0.0  ;;  %v1816_v11 = vld [vmem:[%s3943_s11] ss:$4 sm:$0x3]  ;;  %s2838_s11 = smov [#allocation6]  }
 0x506   :  { %v1746_v32 = vsel %vm1730_vm8, %v1722_v20, %v1738_v26  ;;  %v1772_v29 = vrot.slane %v1740_v28, 7  ;;  %v1774_v33 = vrot.slane %v1742_v30, 7  ;;  %v1778_v61 = vrot.slane %v1744_v31, 7  ;;  %s2152_s21 = sshll.u32 %s2838_s11, 4  ;;  %s2153_s21 = int_to_ptr.vmem [resolvable:$true] %s2152_s21 }
 0x507   :  { %v1780_v34 = vrot.slane %v1746_v32, 7  ;;  %v1733_v35 = vmul.f32 0.1, %v1717_v15  ;;  %v1735_v36 = vmul.f32 0.1, %v1719_v13  ;;  %v3826_v60 = vrot.slane %v2188_v45, %v3780_v49  ;;  %s2812_s22 = scalar_lea.vmem %s2153_s21, 32  ;;  %p2817_p1 = scmp.lt.s32.totalorder %s2153_s21, %s2153_s21 }
 0x508   :  { %v1775_v37 = vsel %vm1771_vm4, %v1772_v29, %v1774_v33  ;;  %1796 = vst [vmem:[#allocation5] sm:$0xfe] %v1772_v29  ;;  %1800 = vst [vmem:[#allocation5 + $0x20] sm:$0x1] %v1774_v33  ;;  %v1737_v38 = vmul.f32 0.1, %v1721_v14  ;;  %v3838_v7 = vrot.slane %v2188_v45, %v3786_v51  ;;  %v3855_v30 = vrot.slane %v1816_v11, %v3780_v49  ;;  %p2813_p0 = scmp.ne.s32.totalorder %s2153_s21, %s2812_s22  ;;  %p2818_p2 = scmp.lt.s32.totalorder %s2812_s22, %s2812_s22 }
 0x509   :  { %1802 = vst [vmem:[#allocation5 + $0x30] sm:$0xfe] %v1778_v61  ;;  %v1739_v39 = vmul.f32 0.1, %v1723_v25  ;;  %v1781_v41 = vsel %vm1771_vm4, %v1778_v61, %v1780_v34  ;;  %1798 = vst [vmem:[#allocation5 + $0x10] sm:$0xff] %v1775_v37  ;;  %v1741_v42 = vsel %vm1725_vm9, %v1717_v15, %v1733_v35  ;;  %v1743_v43 = vsel %vm1727_vm10, %v1719_v13, %v1735_v36 }
 0x50a   :  { %1806 = vst [vmem:[#allocation5 + $0x50] sm:$0x1] %v1780_v34  ;;  %1804 = vst [vmem:[#allocation5 + $0x40] sm:$0xff] %v1781_v41  ;;  %v1745_v47 = vsel %vm1729_vm11, %v1721_v14, %v1737_v38  ;;  %v1773_v52 = vrot.slane %v1741_v42, 7  ;;  %v1776_v54 = vrot.slane %v1743_v43, 7  ;;  %v1952_v57 = vmul.f32 %v3799_v16, %v1775_v37  ;;  %p2819_p3 = por %p2818_p2, %p2817_p1 }
 0x50b   :  { %v1747_v50 = vsel %vm1731_vm12, %v1723_v25, %v1739_v39  ;;  %v1779_v55 = vrot.slane %v1745_v47, 7  ;;  %v2016_v58 = vmul.f32 %v3805_v27, %v1775_v37  ;;  %v1956_v62 = vmul.f32 %v3799_v16, %v1781_v41 }
 0x50c   :  { %v1782_v56 = vrot.slane %v1747_v50, 7  ;;  %v1777_v59 = vsel %vm1771_vm4, %v1773_v52, %v1776_v54  ;;  %1797 = vst [vmem:[#allocation5 + $0x8] sm:$0xfe] %v1773_v52  ;;  %1801 = vst [vmem:[#allocation5 + $0x28] sm:$0x1] %v1776_v54  ;;  %v2022_v2 = vmul.f32 %v3805_v27, %v1781_v41  ;;  %v3860_v33 = vrot.slane %v1816_v11, %v3786_v51  ;;  %p2820_p4 = pnand %p2819_p3, %p2813_p0 }
 0x50d   :  { %1799 = vst [vmem:[#allocation5 + $0x18] sm:$0xff] %v1777_v59  ;;  %1803 = vst [vmem:[#allocation5 + $0x38] sm:$0xfe] %v1779_v55  ;;  %v1953_v63 = vmul.f32 %v3809_v40, %v1777_v59  ;;  %v2017_v0 = vmul.f32 %v3818_v46, %v1777_v59 }
 0x50e   :  { %v1783_v19 = vsel %vm1771_vm4, %v1779_v55, %v1782_v56  ;;  %1807 = vst [vmem:[#allocation5 + $0x58] sm:$0x1] %v1782_v56 }
 0x50f   :  { %1805 = vst [vmem:[#allocation5 + $0x48] sm:$0xff] %v1783_v19  ;;  %v1957_v3 = vmul.f32 %v3809_v40, %v1783_v19  ;;  %v2023_v4 = vmul.f32 %v3818_v46, %v1783_v19  ;;  %v1861_v6 = vld [vmem:[#allocation5] sm:$0xfc]  ;;  %v1964_v53 = vadd.f32 %v1953_v63, %v1952_v57  ;;  %v3835_v1 = vadd.f32 %v2017_v0, %v2016_v58 }
 0x510   :  { %v1865_v5 = vld [vmem:[#allocation5 + $0x30] sm:$0xfc]  ;;  %v1882_v8 = vmul.f32 %v3826_v60, %v1861_v6  ;;  %v1929_v9 = vld [vmem:[#allocation5] sm:$0xf8] }
 0x511   :  { %v1972_v17 = vadd.f32 %v1957_v3, %v1956_v62  ;;  %v1886_v18 = vmul.f32 %v3826_v60, %v1865_v5  ;;  %v3842_v10 = vadd.f32 %v2023_v4, %v2022_v2  ;;  %v1950_v21 = vmul.f32 %v3799_v16, %v1929_v9  ;;  %v1933_v23 = vld [vmem:[#allocation5 + $0x30] sm:$0xf8]  ;;  %v1808_v37 = vld [vmem:[#allocation5] sm:$0xfe]  ;;  %v1995_v5 = vld [vmem:[#allocation5 + $0x20] sm:$0x1] }
 0x512   :  { %v1891_v14 = vsel %vm1890_vm13, %v1882_v8, 0.0  ;;  %v1954_v29 = vmul.f32 %v3799_v16, %v1933_v23  ;;  %v1828_v16 = vmul.f32 %v3855_v30, %v1808_v37  ;;  %v1812_v42 = vld [vmem:[#allocation5 + $0x30] sm:$0xfe]  ;;  %v1993_v58 = vld [vmem:[#allocation5] sm:$0xf0] }
 0x513   :  { %v1862_v12 = vld [vmem:[#allocation5 + $0x8] sm:$0xfc]  ;;  %v1901_v25 = vsel %vm1890_vm13, %v1886_v18, 0.0  ;;  %v1959_v34 = vsel %vm1958_vm14, %v1950_v21, 0.0  ;;  %v1997_v45 = vld [vmem:[#allocation5 + $0x30] sm:$0xf0]  ;;  %v1832_v54 = vmul.f32 %v3855_v30, %v1812_v42  ;;  %v2014_v3 = vmul.f32 %v3805_v27, %v1993_v58 }
 0x514   :  { %v1930_v20 = vld [vmem:[#allocation5 + $0x8] sm:$0xf8]  ;;  %v1866_v15 = vld [vmem:[#allocation5 + $0x38] sm:$0xfc]  ;;  %v1883_v13 = vmul.f32 %v3838_v7, %v1862_v12  ;;  %v1967_v39 = vsel %vm1958_vm14, %v1954_v29, 0.0  ;;  %v1837_v50 = vsel %vm1836_vm15, %v1828_v16, 0.0  ;;  %v2020_v56 = vmul.f32 %v3805_v27, %v1997_v45 }
 0x515   :  { %v1951_v22 = vmul.f32 %v3809_v40, %v1930_v20  ;;  %v1887_v24 = vmul.f32 %v3838_v7, %v1866_v15  ;;  %v1934_v26 = vld [vmem:[#allocation5 + $0x38] sm:$0xf8]  ;;  %v1809_v38 = vld [vmem:[#allocation5 + $0x8] sm:$0xfe]  ;;  %v1867_v62 = vld [vmem:[#allocation5 + $0x40] sm:$0x7f]  ;;  %v2018_v20 = vmul.f32 %v3805_v27, %v1995_v5 }
 0x516   :  { %v1892_v28 = vsel %vm1890_vm13, %v1883_v13, 0.0  ;;  %v1955_v36 = vmul.f32 %v3809_v40, %v1934_v26  ;;  %v1829_v51 = vmul.f32 %v3860_v33, %v1809_v38  ;;  %v1813_v43 = vld [vmem:[#allocation5 + $0x38] sm:$0xfe]  ;;  %v1994_v59 = vld [vmem:[#allocation5 + $0x8] sm:$0xf0]  ;;  %v1847_v0 = vsel %vm1836_vm15, %v1832_v54, 0.0 }
 0x517   :  { %v1902_v31 = vsel %vm1890_vm13, %v1887_v24, 0.0  ;;  %v1893_v32 = vadd.f32 %v1892_v28, %v1891_v14  ;;  %v1960_v35 = vsel %vm1958_vm14, %v1951_v22, 0.0  ;;  %v1998_v40 = vld [vmem:[#allocation5 + $0x38] sm:$0xf0]  ;;  %v1833_v55 = vmul.f32 %v3860_v33, %v1813_v43  ;;  %v1868_v19 = vld [vmem:[#allocation5 + $0x48] sm:$0x7f] }
 0x518   :  { %v1903_v61 = vadd.f32 %v1902_v31, %v1901_v25  ;;  %v1961_v49 = vadd.f32 %v1960_v35, %v1959_v34  ;;  %v1968_v41 = vsel %vm1958_vm14, %v1955_v36, 0.0  ;;  %v1838_v52 = vsel %vm1836_vm15, %v1829_v51, 0.0  ;;  %v1996_v18 = vld [vmem:[#allocation5 + $0x28] sm:$0x1]  ;;  %v1810_v9 = vld [vmem:[#allocation5 + $0x10] sm:$0x3f] }
 0x519   :  { %1894 = vadd.xlane.f32.xlu0 %v1893_v32  ;;  %v1969_v47 = vadd.f32 %v1968_v41, %v1967_v39  ;;  %v2021_v57 = vmul.f32 %v3818_v46, %v1998_v40  ;;  %v1839_v63 = vadd.f32 %v1838_v52, %v1837_v50  ;;  %v1848_v2 = vsel %vm1836_vm15, %v1833_v55, 0.0  ;;  %v1811_v11 = vld [vmem:[#allocation5 + $0x18] sm:$0x3f]  ;;  %v1863_v25 = vld [vmem:[#allocation5 + $0x10] sm:$0x7f] }
 0x51a   :  { %1904 = vadd.xlane.f32.xlu1 %v1903_v61  ;;  %v2015_v4 = vmul.f32 %v3818_v46, %v1994_v59  ;;  %v2040_v6 = vsel %vm2026_vm2, %v2020_v56, 0.0  ;;  %v1888_v8 = vmul.f32 %v3826_v60, %v1867_v62  ;;  %v1849_v12 = vadd.f32 %v1848_v2, %v1847_v0  ;;  %v1864_v26 = vld [vmem:[#allocation5 + $0x18] sm:$0x7f]  ;;  %v1814_v28 = vld [vmem:[#allocation5 + $0x40] sm:$0x3f] }
 0x51b   :  { %v2027_v13 = vsel %vm2026_vm2, %v2014_v3, 0.0  ;;  %v2019_v21 = vmul.f32 %v3818_v46, %v1996_v18  ;;  %v1830_v24 = vmul.f32 %v3855_v30, %v1810_v9  ;;  %v1815_v31 = vld [vmem:[#allocation5 + $0x48] sm:$0x3f]  ;;  %v2035_v29 = vsel %vm1771_vm4, %v2018_v20, 0.0  ;;  %v1999_v41 = vld [vmem:[#allocation5 + $0x50] sm:$0x1] }
 0x51c   :  { %v2028_v14 = vsel %vm2026_vm2, %v2015_v4, 0.0  ;;  %v1906_v22 = vsel %vm70_vm0, %v1888_v8, 0.0  ;;  %v1884_v35 = vmul.f32 %v3826_v60, %v1863_v25  ;;  %v1885_v36 = vmul.f32 %v3838_v7, %v1864_v26  ;;  %v2000_v16 = vld [vmem:[#allocation5 + $0x58] sm:$0x1] }
 0x51d   :  { %1962 = vadd.xlane.f32.xlu0 %v1961_v49  ;;  %v2029_v32 = vadd.f32 %v2028_v14, %v2027_v13  ;;  %v2036_v34 = vsel %vm1771_vm4, %v2019_v21, 0.0  ;;  %v1842_v37 = vsel %vm115_vm1, %v1830_v24, 0.0  ;;  %v1834_v49 = vmul.f32 %v3855_v30, %v1814_v28 }
 0x51e   :  { %1965 = vadd.xlane.f32.xlu1 %v1964_v53  ;;  %v2041_v53 = vsel %vm2026_vm2, %v2021_v57, 0.0  ;;  %v1835_v39 = vmul.f32 %v3860_v33, %v1815_v31  ;;  %v2037_v51 = vadd.f32 %v2036_v34, %v2035_v29  ;;  %v1896_v43 = vsel %vm70_vm0, %v1884_v35, 0.0 }
 0x51f   :  { %v2042_v15 = vadd.f32 %v2041_v53, %v2040_v6  ;;  %v1897_v60 = vsel %vm70_vm0, %v1885_v36, 0.0  ;;  %v2024_v40 = vmul.f32 %v3805_v27, %v1999_v41  ;;  %v2025_v30 = vmul.f32 %v3818_v46, %v2000_v16 }
 0x520   :  { %v1853_v45 = vsel %vm115_vm1, %v1835_v39, 0.0  ;;  %v2837_v55 = vmov 0  }
 0x521   :  { %1970 = vadd.xlane.f32.xlu0 %v1969_v47  ;;  %v2048_v50 = vsel %vm1771_vm4, %v2024_v40, 0.0  ;;  %v2049_v52 = vsel %vm1771_vm4, %v2025_v30, 0.0  ;;  %2787 = vset.pattern.permute.xlu1 %v2837_v55  ;;  %vm2144_vm4 = vcmask 100353  }
 0x522   :  { %1973 = vadd.xlane.f32.xlu1 %v1972_v17  ;;  %v1889_v17 = vmul.f32 %v3838_v7, %v1868_v19  ;;  %v1852_v7 = vsel %vm115_vm1, %v1834_v49, 0.0  ;;  %v2050_v54 = vadd.f32 %v2049_v52, %v2048_v50  ;;  %2786 = vset.pattern.permute.xlu0 %v2837_v55 }
 0x523   :  { %v1854_v47 = vadd.f32 %v1853_v45, %v1852_v7 }
 0x524   :  { %v1907_v23 = vsel %vm70_vm0, %v1889_v17, 0.0 }
 0x525   :  { %1840 = vadd.xlane.f32.xlu0 %v1839_v63  ;;  %v1908_v61 = vadd.f32 %v1907_v23, %v1906_v22 }
 0x526   :  { %2033 = vadd.xlane.f32.xlu1 %v3835_v1  ;;  %v1831_v1 = vmul.f32 %v3860_v33, %v1811_v11  ;;  %v1898_v33 = vadd.f32 %v1897_v60, %v1896_v43 }
 0x528   :  { %v1843_v38 = vsel %vm115_vm1, %v1831_v1, 0.0 }
 0x529   :  { %1850 = vadd.xlane.f32.xlu0 %v1849_v12  ;;  %v1844_v42 = vadd.f32 %v1843_v38, %v1842_v37 }
 0x52a   :  { %2043 = vadd.xlane.f32.xlu1 %v2042_v15 }
 0x52d   :  { %2030 = vadd.xlane.f32.xlu0 %v2029_v32 }
 0x52e   :  { %1909 = vadd.xlane.f32.xlu1 %v1908_v61 }
 0x531   :  { %2038 = vadd.xlane.f32.xlu0 %v2037_v51 }
 0x532   :  { %1845 = vadd.xlane.f32.xlu1 %v1844_v42 }
 0x535   :  { %1899 = vadd.xlane.f32.xlu0 %v1898_v33 }
 0x536   :  { %1855 = vadd.xlane.f32.xlu1 %v1854_v47 }
 0x539   :  { %2046 = vadd.xlane.f32.xlu0 %v3842_v10 }
 0x53a   :  { %2051 = vadd.xlane.f32.xlu1 %v2050_v54 }
 0x5a6   :  { %v1895_v56 = vpop.xlane.xlu0 %1894 }
 0x5a7   :  { %v1905_v27 = vpop.xlane.xlu1 %1904  ;;  %v1915_v9 = vrot.slane %v1895_v56, 1 }
 0x5a8   :  { %v1918_v6 = vrot.slane %v1905_v27, 1 }
 0x5aa   :  { %v1963_v57 = vpop.xlane.xlu0 %1962 }
 0x5ab   :  { %v1966_v46 = vpop.xlane.xlu1 %1965  ;;  %v1979_v8 = vrot.slane %v1963_v57, 2 }
 0x5ac   :  { %v1980_v17 = vrot.slane %v1966_v46, 2 }
 0x5ae   :  { %v1971_v58 = vpop.xlane.xlu0 %1970  ;;  %v1981_v1 = vsel %vm115_vm1, %v1979_v8, %v1980_v17 }
 0x5af   :  { %v1974_v59 = vpop.xlane.xlu1 %1973  ;;  %v1982_v11 = vrot.slane %v1971_v58, 2 }
 0x5b0   :  { %v1983_v12 = vrot.slane %v1974_v59, 2 }
 0x5b2   :  { %v1841_v62 = vpop.xlane.xlu0 %1840  ;;  %v1984_v31 = vsel %vm115_vm1, %v1982_v11, %v1983_v12  ;;  %vm2141_vm1 = vcmask 1042434  }
 0x5b3   :  { %v2034_v19 = vpop.xlane.xlu1 %2033 }
 0x5b4   :  { %v2061_v25 = vrot.slane %v2034_v19, 3 }
 0x5b6   :  { %v1851_v63 = vpop.xlane.xlu0 %1850 }
 0x5b7   :  { %v2044_v0 = vpop.xlane.xlu1 %2043 }
 0x5b8   :  { %v2065_v32 = vrot.slane %v2044_v0, 3 }
 0x5ba   :  { %v2031_v2 = vpop.xlane.xlu0 %2030 }
 0x5bb   :  { %v1910_v3 = vpop.xlane.xlu1 %1909  ;;  %v2060_v21 = vrot.slane %v2031_v2, 3 }
 0x5bc   :  { %v1919_v4 = vrot.slane %v1910_v3, 1 }
 0x5bd   :  { %v2062_v49 = vsel %vm2059_vm3, %v2060_v21, %v2061_v25 }
 0x5be   :  { %v2039_v5 = vpop.xlane.xlu0 %2038  ;;  %v1920_v53 = vsel %vm70_vm0, %v1918_v6, %v1919_v4 }
 0x5bf   :  { %v1846_v10 = vpop.xlane.xlu1 %1845  ;;  %v1927_v13 = vadd.f32 %v1920_v53, %v1851_v63  ;;  %v2063_v14 = vrot.slane %v2039_v5, 3 }
 0x5c1   :  { %v2064_v35 = vsel %vm2059_vm3, %v2061_v25, %v2063_v14  ;;  %v1991_v37 = vadd.f32 %v1984_v31, %v1927_v13 }
 0x5c2   :  { %v1900_v18 = vpop.xlane.xlu0 %1899 }
 0x5c3   :  { %v1916_v20 = vrot.slane %v1900_v18, 1  ;;  %v1856_v15 = vpop.xlane.xlu1 %1855 }
 0x5c4   :  { %v1928_v24 = vadd.f32 %v1919_v4, %v1856_v15 }
 0x5c5   :  { %v1917_v22 = vsel %vm70_vm0, %v1915_v9, %v1916_v20  ;;  %v1926_v23 = vadd.f32 %v1916_v20, %v1846_v10  ;;  %vm2130_vm0 = vcmask 121912  }
 0x5c6   :  { %v1925_v26 = vadd.f32 %v1917_v22, %v1841_v62  ;;  %v2047_v28 = vpop.xlane.xlu0 %2046  ;;  %v1992_v41 = vadd.f32 %v1983_v12, %v1928_v24  ;;  %v2119_v62 = vand.u32 127, %v1686_v44 }
 0x5c7   :  { %v1990_v29 = vadd.f32 %v1980_v17, %v1926_v23  ;;  %v2066_v61 = vrot.slane %v2047_v28, 3  ;;  %v2052_v34 = vpop.xlane.xlu1 %2051 }
 0x5c8   :  { %v1989_v36 = vadd.f32 %v1981_v1, %v1925_v26  ;;  %v2068_v38 = vrot.slane %v2052_v34, 3  ;;  %v2125_v19 = vadd.s32 4294967289, %v2119_v62  ;;  %v2120_v63 = vadd.s32 1, %v2119_v62 }
 0x5c9   :  { %v2075_v39 = vadd.f32 %v2064_v35, %v1990_v29  ;;  %v2067_v16 = vsel %vm2059_vm3, %v2065_v32, %v2066_v61 }
 0x5ca   :  { %v2074_v51 = vadd.f32 %v2062_v49, %v1989_v36  ;;  %v2076_v42 = vadd.f32 %v2067_v16, %v1991_v37  ;;  %v2069_v43 = vsel %vm2059_vm3, %v2066_v61, %v2068_v38  ;;  %v2128_v2 = vsub.s32 %v2125_v19, %v3777_v48 }
 0x5cb   :  { %v2192_v60 = vmul.f32 -1.442695, %v2075_v39  ;;  %v2077_v7 = vadd.f32 %v2069_v43, %v1992_v41  ;;  %v2123_v3 = vsub.s32 %v2120_v63, %v3777_v48 }
 0x5cc   :  { %v2191_v45 = vmul.f32 -1.442695, %v2074_v51  ;;  %v2193_v40 = vmul.f32 -1.442695, %v2076_v42 }
 0x5cd   :  { %2796 = vpow2.f32 %v2192_v60  ;;  %v2194_v30 = vmul.f32 -1.442695, %v2077_v7 }
 0x5ce   :  { %2798 = vpow2.f32 %v2191_v45 }
 0x5cf   :  { %2800 = vpow2.f32 %v2193_v40 }
 0x5d0   :  { %2802 = vpow2.f32 %v2194_v30 }
 0x5d7   :  { %v2797_v33 = vpop.eup %2796 }
 0x5d8   :  { %v2799_v47 = vpop.eup %2798  ;;  %v2091_v50 = vadd.f32 1.0, %v2797_v33 }
 0x5d9   :  { %v2801_v52 = vpop.eup %2800  ;;  %v2090_v54 = vadd.f32 1.0, %v2799_v47 }
 0x5da   :  { %2804 = vrcp.f32 %v2091_v50  ;;  %v2092_v55 = vadd.f32 1.0, %v2801_v52  ;;  %v2803_v56 = vpop.eup %2802 }
 0x5db   :  { %2806 = vrcp.f32 %v2090_v54  ;;  %v2093_v27 = vadd.f32 1.0, %v2803_v56 }
 0x5dc   :  { %2808 = vrcp.f32 %v2092_v55 }
 0x5dd   :  { %2810 = vrcp.f32 %v2093_v27 }
 0x5e4   :  { %v2805_v57 = vpop.eup %2804 }
 0x5e5   :  { %v2807_v46 = vpop.eup %2806  ;;  %2110 = vperm.xlu1 %2787, %v2805_v57  }
 0x5e6   :  { %2107 = vperm.xlu0 %2786, %v2807_v46   ;;  %v2809_v58 = vpop.eup %2808 }
 0x5e7   :  { %v2811_v59 = vpop.eup %2810 }
 0x5e9   :  { %2113 = vperm.xlu1 %2787, %v2809_v58  }
 0x5ed   :  { %2116 = vperm.xlu1 %2787, %v2811_v59  }
 0x664   :  { %v2111_v0 = vpop.permute.xlu1 %2110 }
 0x665   :  { %v2108_v4 = vpop.permute.xlu0 %2107  ;;  %v2129_v6 = vrot.slane %v2111_v0, %v2128_v2 }
 0x666   :  { %v2124_v10 = vrot.slane %v2108_v4, %v2123_v3 }
 0x668   :  { %v2114_v5 = vpop.permute.xlu1 %2113  ;;  %v2131_v44 = vsel %vm2130_vm0, %v2129_v6, %v2124_v10 }
 0x669   :  { %v2135_v8 = vrot.slane %v2114_v5, %v2123_v3 }
 0x66c   :  { %v2117_v53 = vpop.permute.xlu1 %2116 }
 0x66d   :  { %v2139_v17 = vrot.slane %v2117_v53, %v2128_v2 }
 0x66f   :  { %v2140_v18 = vsel %vm2130_vm0, %v2139_v17, %v2135_v8 }
 0x670   :  { %v2142_v9 = vsel %vm2141_vm1, %v2140_v18, %v2131_v44 }
 0x671   :  { %2145 = vst.msk [vmem:[#allocation6 - $0x1] sm:$0x6] %vm2144_vm4, %v2142_v9 }
 0x672   :  { %2823 = shalt.err (!%p2820_p4)
}
 0x673   :  { %s2824_s25 = scalar_lea.hbm %s3944_s12, 32 }
 0x674   :  { %p2825_p5 = scmp.ne.s32.totalorder %s3944_s12, %s2824_s25  ;;  %p2828_p6 = scmp.lt.u32.totalorder %s2824_s25, %s3944_s12 }
 0x676   :  { %p2830_p7 = pnand %p2828_p6, %p2825_p5 }
 0x678   :  { %2833 = shalt.err (!%p2830_p7)
}
 0x679   :  { %2155 = dma.vmem_to_hbm [thread:$0]  %s2153_s21, 32, %s3944_s12, [#allocation7]  }
 0x67a   :  { %2834 = dma.done.wait [#allocation7], 32  }
 0x67b   :  { %2835 = vsyncadd [#allocation7], 4294967264 }
 0x67c   :  { %2159 = vsyncpa [#allocation7], 1 }

</bundles_post_ra>
